<compile_context>
chip_gen: v7x
topology: tpu7x:2x2x1
jax: 0.10.0
libtpu: 0.0.40
codegen_flags: <defaults>
</compile_context>

<pallas_src>
import functools

import jax
import jax.numpy as jnp
from jax import lax
from jax.experimental import pallas as pl
from jax.experimental.pallas import tpu as pltpu


# ------------------------------ Pallas kernel ------------------------------ #

def _encoder_kernel(p_ref, w1_ref, b1_ref, w2_ref, b2_ref,
                    w3a_ref, b3a_ref, wca_ref, bca_ref,
                    w3b_ref, b3b_ref, wcb_ref, bcb_ref,
                    o_ref, q_ref, r_ref, *, c, oh, ow):
    """One batch element per grid step; every layer fused, VMEM resident."""
    f32 = jnp.float32
    bf16 = jnp.bfloat16
    m = oh * ow                       # number of final output pixels

    # Padded scratch buffers: borders must be zero (conv zero-padding).
    q_ref[...] = jnp.zeros_like(q_ref)
    r_ref[...] = jnp.zeros_like(r_ref)

    # ---- conv1: 4x4, stride 2, pad 1 — one MXU matmul on prebuilt patches.
    # Patch rows are grouped by output-position parity g = 2*(ho%2) + (wo%2),
    # 16 output positions per group, (ho//2, wo//2) row-major within a group.
    h1 = jnp.dot(p_ref[0], w1_ref[...], preferred_element_type=f32)
    h1 = h1 + b1_ref[...]                                   # (4*m, c) f32

    # Scatter the four parity groups into zero-padded, parity-split buffers:
    #   q[2a+b, i, j, :] == h1_padded[2i + a, 2j + b, :]
    # (h1 spatial is (2*oh, 2*ow), padded by one zero ring for conv2.)
    q_ref[0, 1:1 + oh, 1:1 + ow, :] = h1[3 * m:4 * m].reshape(oh, ow, c)  # odd r , odd c
    q_ref[1, 1:1 + oh, 0:ow, :] = h1[2 * m:3 * m].reshape(oh, ow, c)      # odd r , even c
    q_ref[2, 0:oh, 1:1 + ow, :] = h1[m:2 * m].reshape(oh, ow, c)          # even r, odd c
    q_ref[3, 0:oh, 0:ow, :] = h1[0:m].reshape(oh, ow, c)                  # even r, even c

    # ---- conv2: 4x4, stride 2, pad 1 — 16 tap matmuls, contiguous slices.
    acc = jnp.zeros((m, c), f32)
    for kh in range(4):
        for kw in range(4):
            g = (kh % 2) * 2 + (kw % 2)
            slab = q_ref[g, kh // 2:kh // 2 + oh, kw // 2:kw // 2 + ow, :]
            acc = acc + jnp.dot(slab.reshape(m, c).astype(bf16),
                                w2_ref[kh * 4 + kw],
                                preferred_element_type=f32)
    h = acc + b2_ref[...]                                   # (m, c) f32

    # ---- two ResBlocks: h = h + conv1x1(relu(conv3x3(relu(h)))) ------------
    for w3_ref, b3_ref, wc_ref, bc_ref in (
            (w3a_ref, b3a_ref, wca_ref, bca_ref),
            (w3b_ref, b3b_ref, wcb_ref, bcb_ref)):
        # ReLU applied once to the (m, c) activation (not to 9x tap slabs).
        r_ref[1:1 + oh, 1:1 + ow, :] = jnp.maximum(h, 0.0).reshape(oh, ow, c)
        acc = jnp.zeros((m, c), f32)
        for kh in range(3):                    # 3x3, stride 1, pad 1
            for kw in range(3):
                slab = r_ref[kh:kh + oh, kw:kw + ow, :]
                acc = acc + jnp.dot(slab.reshape(m, c).astype(bf16),
                                    w3_ref[kh * 3 + kw],
                                    preferred_element_type=f32)
        t = jnp.maximum(acc + b3_ref[...], 0.0)             # f32 elementwise
        h = h + jnp.dot(t.astype(bf16), wc_ref[...],
                        preferred_element_type=f32) + bc_ref[...]

    # Encoder's final ReLU, single narrow store of the required output tile.
    o_ref[0] = jnp.maximum(h, 0.0).reshape(oh, ow, c).astype(o_ref.dtype)


# ------------------------------- JAX wrapper -------------------------------- #

def _conv1_patches(x):
    """Patch matrix for the first 4x4/s2/p1 conv, rows grouped by parity.

    x: (N, H, W, Cin) -> (N, (H//2)*(W//2), 16*Cin).  Row order is
    [group (ho%2, wo%2)] major, (ho//2, wo//2) row-major within a group;
    feature order is (kh, kw, cin), matching w.reshape(-1, cout).
    """
    n, hh, ww, cin = x.shape
    ho, wo = hh // 2, ww // 2
    xp = jnp.pad(x, ((0, 0), (1, 1), (1, 1), (0, 0)))
    cols = []
    for kh in range(4):
        for kw in range(4):
            cols.append(xp[:, kh:kh + 2 * ho - 1:2, kw:kw + 2 * wo - 1:2, :])
    pat = jnp.concatenate(cols, axis=-1)                     # (N, ho, wo, 16*cin)
    pat = pat.reshape(n, ho // 2, 2, wo // 2, 2, 16 * cin)
    pat = pat.transpose(0, 2, 4, 1, 3, 5)                    # group by parity
    return pat.reshape(n, ho * wo, 16 * cin)


def encoder_forward(x, params):
    """Pallas implementation of Encoder.forward (NHWC in, NHWC out)."""
    n, hh, ww, cin = x.shape
    c = params["w1"].shape[-1]
    assert hh % 4 == 0 and ww % 4 == 0
    oh, ow = hh // 4, ww // 4
    m = oh * ow
    kp = 16 * cin

    bf16 = jnp.bfloat16
    patches = _conv1_patches(x).astype(bf16)                 # (N, 4*m, 16*cin)
    args = [patches,
            params["w1"].reshape(kp, c).astype(bf16), params["b1"].reshape(1, c),
            params["w2"].reshape(16, c, c).astype(bf16), params["b2"].reshape(1, c)]
    for i in range(2):
        args += [params[f"rb{i}_w3"].reshape(9, c, c).astype(bf16),
                 params[f"rb{i}_b3"].reshape(1, c),
                 params[f"rb{i}_w1"].reshape(c, c).astype(bf16),
                 params[f"rb{i}_b1"].reshape(1, c)]

    def const(*shape):
        zeros = (0,) * len(shape)
        return pl.BlockSpec(shape, lambda b, z=zeros: z)

    in_specs = [pl.BlockSpec((1, 4 * m, kp), lambda b: (b, 0, 0)),
                const(kp, c), const(1, c),
                const(16, c, c), const(1, c)]
    for _ in range(2):
        in_specs += [const(9, c, c), const(1, c), const(c, c), const(1, c)]

    flops = 2 * n * m * c * (4 * kp + 16 * c + 2 * (9 * c + c))
    bytes_accessed = (sum(int(a.size) * a.dtype.itemsize for a in args)
                      + n * m * c * 4)

    kernel = functools.partial(_encoder_kernel, c=c, oh=oh, ow=ow)
    return pl.pallas_call(
        kernel,
        out_shape=jax.ShapeDtypeStruct((n, oh, ow, c), jnp.float32),
        grid=(n,),
        in_specs=in_specs,
        out_specs=pl.BlockSpec((1, oh, ow, c), lambda b: (b, 0, 0, 0)),
        scratch_shapes=[pltpu.VMEM((4, oh + 1, ow + 1, c), jnp.float32),  # conv2 parity bufs
                        pltpu.VMEM((oh + 2, ow + 2, c), jnp.float32)],     # 3x3 padded buf
        compiler_params=pltpu.CompilerParams(dimension_semantics=("parallel",)),
        cost_estimate=pl.CostEstimate(flops=flops, transcendentals=0,
                                      bytes_accessed=bytes_accessed),
    )(*args)


# --------------------------- parameter initializers ------------------------- #

def init_conv(key, k, cin, cout):
    """Deterministic init mimicking PyTorch Conv2d defaults; weight in HWIO."""
    kw_, kb = jax.random.split(key)
    fan_in = cin * k * k
    bound = 1.0 / (fan_in ** 0.5)
    w = jax.random.uniform(kw_, (k, k, cin, cout), jnp.float32, -bound, bound)
    b = jax.random.uniform(kb, (cout,), jnp.float32, -bound, bound)
    return w, b


# --------------------------- pure-JAX reference ----------------------------- #

def _conv_ref(x, w, b, stride, pad):
    y = lax.conv_general_dilated(x, w, (stride, stride),
                                 [(pad, pad), (pad, pad)],
                                 dimension_numbers=("NHWC", "HWIO", "NHWC"))
    return y + b


def encoder_ref(x, params):
    h = _conv_ref(x, params["w1"], params["b1"], 2, 1)
    h = _conv_ref(h, params["w2"], params["b2"], 2, 1)
    for i in range(2):
        r = _conv_ref(jax.nn.relu(h), params[f"rb{i}_w3"], params[f"rb{i}_b3"], 1, 1)
        # 1x1 conv has NO padding in the PyTorch module.
        r = _conv_ref(jax.nn.relu(r), params[f"rb{i}_w1"], params[f"rb{i}_b1"], 1, 0)
        h = h + r
    return jax.nn.relu(h)


# ---------------------------------- main ------------------------------------ #

if __name__ == "__main__":
    key = jax.random.PRNGKey(0)
    in_channels, channels = 4, 32
    N, H, W = 2, 16, 16

    keys = jax.random.split(key, 7)
    params = {}
    params["w1"], params["b1"] = init_conv(keys[0], 4, in_channels, channels)
    params["w2"], params["b2"] = init_conv(keys[1], 4, channels, channels)
    params["rb0_w3"], params["rb0_b3"] = init_conv(keys[2], 3, channels, channels)
    params["rb0_w1"], params["rb0_b1"] = init_conv(keys[3], 1, channels, channels)
    params["rb1_w3"], params["rb1_b3"] = init_conv(keys[4], 3, channels, channels)
    params["rb1_w1"], params["rb1_b1"] = init_conv(keys[5], 1, channels, channels)

    x = jax.random.normal(keys[6], (N, H, W, in_channels), jnp.float32)

    out = jax.block_until_ready(encoder_forward(x, params))
    ref = jax.block_until_ready(encoder_ref(x, params))

    assert out.shape == (N, H // 4, W // 4, channels), out.shape
    assert bool(jnp.all(jnp.isfinite(out)))
    # bf16 MXU operands (f32 accumulation) compared against an f32 reference.
    err = float(jnp.max(jnp.abs(out - ref)))
    assert bool(jnp.allclose(out, ref, rtol=2e-2, atol=2e-2)), err
    print("KERNEL_OK")
</pallas_src>

<mosaic_0001>
module attributes {stable_mosaic.version = 11 : i64} {
  func.func @_encoder_kernel(%arg0: i32, %arg1: memref<1x64x64xbf16, #tpu.memory_space<vmem>>, %arg2: memref<64x32xbf16, #tpu.memory_space<vmem>>, %arg3: memref<1x32xf32, #tpu.memory_space<vmem>>, %arg4: memref<16x32x32xbf16, #tpu.memory_space<vmem>>, %arg5: memref<1x32xf32, #tpu.memory_space<vmem>>, %arg6: memref<9x32x32xbf16, #tpu.memory_space<vmem>>, %arg7: memref<1x32xf32, #tpu.memory_space<vmem>>, %arg8: memref<32x32xbf16, #tpu.memory_space<vmem>>, %arg9: memref<1x32xf32, #tpu.memory_space<vmem>>, %arg10: memref<9x32x32xbf16, #tpu.memory_space<vmem>>, %arg11: memref<1x32xf32, #tpu.memory_space<vmem>>, %arg12: memref<32x32xbf16, #tpu.memory_space<vmem>>, %arg13: memref<1x32xf32, #tpu.memory_space<vmem>>, %arg14: memref<1x4x4x32xf32, #tpu.memory_space<vmem>>, %arg15: memref<4x5x5x32xf32, #tpu.memory_space<vmem>>, %arg16: memref<6x6x32xf32, #tpu.memory_space<vmem>>) attributes {dimension_semantics = [#tpu.dimension_semantics<parallel>], iteration_bounds = array<i64: 2>, scalar_prefetch = 0 : i64, scratch_operands = 2 : i64, tpu.core_type = #tpu.core_type<tc>, window_params = [{transform_indices = @transform_0, window_bounds = array<i64: 1, 64, 64>}, {pipeline_mode = #tpu.pipeline_mode<synchronous>, transform_indices = @transform_1, window_bounds = array<i64: 64, 32>}, {pipeline_mode = #tpu.pipeline_mode<synchronous>, transform_indices = @transform_2, window_bounds = array<i64: 1, 32>}, {pipeline_mode = #tpu.pipeline_mode<synchronous>, transform_indices = @transform_3, window_bounds = array<i64: 16, 32, 32>}, {pipeline_mode = #tpu.pipeline_mode<synchronous>, transform_indices = @transform_4, window_bounds = array<i64: 1, 32>}, {pipeline_mode = #tpu.pipeline_mode<synchronous>, transform_indices = @transform_5, window_bounds = array<i64: 9, 32, 32>}, {pipeline_mode = #tpu.pipeline_mode<synchronous>, transform_indices = @transform_6, window_bounds = array<i64: 1, 32>}, {pipeline_mode = #tpu.pipeline_mode<synchronous>, transform_indices = @transform_7, window_bounds = array<i64: 32, 32>}, {pipeline_mode = #tpu.pipeline_mode<synchronous>, transform_indices = @transform_8, window_bounds = array<i64: 1, 32>}, {pipeline_mode = #tpu.pipeline_mode<synchronous>, transform_indices = @transform_9, window_bounds = array<i64: 9, 32, 32>}, {pipeline_mode = #tpu.pipeline_mode<synchronous>, transform_indices = @transform_10, window_bounds = array<i64: 1, 32>}, {pipeline_mode = #tpu.pipeline_mode<synchronous>, transform_indices = @transform_11, window_bounds = array<i64: 32, 32>}, {pipeline_mode = #tpu.pipeline_mode<synchronous>, transform_indices = @transform_12, window_bounds = array<i64: 1, 32>}, {transform_indices = @transform_13, window_bounds = array<i64: 1, 4, 4, 32>}]} {
    %cst = arith.constant 0.000000e+00 : f32
    %0 = vector.broadcast %cst : f32 to vector<4x5x5x32xf32>
    %c0 = arith.constant 0 : index
    %c0_0 = arith.constant 0 : index
    %c0_1 = arith.constant 0 : index
    %c0_2 = arith.constant 0 : index
    %1 = vector.load %arg15[%c0, %c0_0, %c0_1, %c0_2] : memref<4x5x5x32xf32, #tpu.memory_space<vmem>>, vector<4x5x5x32xf32>
    tpu.vector_store %arg15[%c0, %c0_0, %c0_1, %c0_2], %0 {strides = array<i32>} : memref<4x5x5x32xf32, #tpu.memory_space<vmem>>, vector<4x5x5x32xf32>,
    %cst_3 = arith.constant 0.000000e+00 : f32
    %2 = vector.broadcast %cst_3 : f32 to vector<6x6x32xf32>
    %c0_4 = arith.constant 0 : index
    %c0_5 = arith.constant 0 : index
    %c0_6 = arith.constant 0 : index
    %3 = vector.load %arg16[%c0_4, %c0_5, %c0_6] : memref<6x6x32xf32, #tpu.memory_space<vmem>>, vector<6x6x32xf32>
    tpu.vector_store %arg16[%c0_4, %c0_5, %c0_6], %2 {strides = array<i32>} : memref<6x6x32xf32, #tpu.memory_space<vmem>>, vector<6x6x32xf32>,
    %c0_7 = arith.constant 0 : index
    %c0_8 = arith.constant 0 : index
    %c0_9 = arith.constant 0 : index
    %4 = vector.load %arg1[%c0_7, %c0_8, %c0_9] : memref<1x64x64xbf16, #tpu.memory_space<vmem>>, vector<1x64x64xbf16>
    %5 = vector.shape_cast %4 : vector<1x64x64xbf16> to vector<64x64xbf16>
    %c0_10 = arith.constant 0 : index
    %c0_11 = arith.constant 0 : index
    %6 = vector.load %arg2[%c0_10, %c0_11] : memref<64x32xbf16, #tpu.memory_space<vmem>>, vector<64x32xbf16>
    %cst_12 = arith.constant dense<0.000000e+00> : vector<64x32xf32>
    %7 = tpu.matmul %5, %6, %cst_12 {dimension_numbers = #tpu.dot_dimension_numbers<[1], [0], [0], [1], [0, 0, 1, 1], [], []>} : vector<64x64xbf16>, vector<64x32xbf16>, vector<64x32xf32> -> vector<64x32xf32>
    %c0_13 = arith.constant 0 : index
    %c0_14 = arith.constant 0 : index
    %8 = vector.load %arg3[%c0_13, %c0_14] : memref<1x32xf32, #tpu.memory_space<vmem>>, vector<1x32xf32>
    %9 = vector.broadcast %8 : vector<1x32xf32> to vector<64x32xf32>
    %10 = arith.addf %7, %9 : vector<64x32xf32>
    %11 = vector.extract_strided_slice %10 {offsets = [48, 0], sizes = [16, 32], strides = [1, 1]} : vector<64x32xf32> to vector<16x32xf32>
    %12 = vector.shape_cast %11 : vector<16x32xf32> to vector<4x4x32xf32>
    %c0_15 = arith.constant 0 : index
    %c1 = arith.constant 1 : index
    %c1_16 = arith.constant 1 : index
    %c0_17 = arith.constant 0 : index
    %13 = vector.load %arg15[%c0_15, %c1, %c1_16, %c0_17] : memref<4x5x5x32xf32, #tpu.memory_space<vmem>>, vector<1x4x4x32xf32>
    %14 = vector.shape_cast %13 : vector<1x4x4x32xf32> to vector<4x4x32xf32>
    %15 = vector.shape_cast %12 : vector<4x4x32xf32> to vector<1x4x4x32xf32>
    tpu.vector_store %arg15[%c0_15, %c1, %c1_16, %c0_17], %15 {strides = array<i32>} : memref<4x5x5x32xf32, #tpu.memory_space<vmem>>, vector<1x4x4x32xf32>,
    %16 = vector.extract_strided_slice %10 {offsets = [32, 0], sizes = [16, 32], strides = [1, 1]} : vector<64x32xf32> to vector<16x32xf32>
    %17 = vector.shape_cast %16 : vector<16x32xf32> to vector<4x4x32xf32>
    %c1_18 = arith.constant 1 : index
    %c1_19 = arith.constant 1 : index
    %c0_20 = arith.constant 0 : index
    %c0_21 = arith.constant 0 : index
    %18 = vector.load %arg15[%c1_18, %c1_19, %c0_20, %c0_21] : memref<4x5x5x32xf32, #tpu.memory_space<vmem>>, vector<1x4x4x32xf32>
    %19 = vector.shape_cast %18 : vector<1x4x4x32xf32> to vector<4x4x32xf32>
    %20 = vector.shape_cast %17 : vector<4x4x32xf32> to vector<1x4x4x32xf32>
    tpu.vector_store %arg15[%c1_18, %c1_19, %c0_20, %c0_21], %20 {strides = array<i32>} : memref<4x5x5x32xf32, #tpu.memory_space<vmem>>, vector<1x4x4x32xf32>,
    %21 = vector.extract_strided_slice %10 {offsets = [16, 0], sizes = [16, 32], strides = [1, 1]} : vector<64x32xf32> to vector<16x32xf32>
    %22 = vector.shape_cast %21 : vector<16x32xf32> to vector<4x4x32xf32>
    %c2 = arith.constant 2 : index
    %c0_22 = arith.constant 0 : index
    %c1_23 = arith.constant 1 : index
    %c0_24 = arith.constant 0 : index
    %23 = vector.load %arg15[%c2, %c0_22, %c1_23, %c0_24] : memref<4x5x5x32xf32, #tpu.memory_space<vmem>>, vector<1x4x4x32xf32>
    %24 = vector.shape_cast %23 : vector<1x4x4x32xf32> to vector<4x4x32xf32>
    %25 = vector.shape_cast %22 : vector<4x4x32xf32> to vector<1x4x4x32xf32>
    tpu.vector_store %arg15[%c2, %c0_22, %c1_23, %c0_24], %25 {strides = array<i32>} : memref<4x5x5x32xf32, #tpu.memory_space<vmem>>, vector<1x4x4x32xf32>,
    %26 = vector.extract_strided_slice %10 {offsets = [0, 0], sizes = [16, 32], strides = [1, 1]} : vector<64x32xf32> to vector<16x32xf32>
    %27 = vector.shape_cast %26 : vector<16x32xf32> to vector<4x4x32xf32>
    %c3 = arith.constant 3 : index
    %c0_25 = arith.constant 0 : index
    %c0_26 = arith.constant 0 : index
    %c0_27 = arith.constant 0 : index
    %28 = vector.load %arg15[%c3, %c0_25, %c0_26, %c0_27] : memref<4x5x5x32xf32, #tpu.memory_space<vmem>>, vector<1x4x4x32xf32>
    %29 = vector.shape_cast %28 : vector<1x4x4x32xf32> to vector<4x4x32xf32>
    %30 = vector.shape_cast %27 : vector<4x4x32xf32> to vector<1x4x4x32xf32>
    tpu.vector_store %arg15[%c3, %c0_25, %c0_26, %c0_27], %30 {strides = array<i32>} : memref<4x5x5x32xf32, #tpu.memory_space<vmem>>, vector<1x4x4x32xf32>,
    %cst_28 = arith.constant 0.000000e+00 : f32
    %31 = vector.broadcast %cst_28 : f32 to vector<16x32xf32>
    %c0_29 = arith.constant 0 : index
    %c0_30 = arith.constant 0 : index
    %c0_31 = arith.constant 0 : index
    %c0_32 = arith.constant 0 : index
    %32 = vector.load %arg15[%c0_29, %c0_30, %c0_31, %c0_32] : memref<4x5x5x32xf32, #tpu.memory_space<vmem>>, vector<1x4x4x32xf32>
    %33 = vector.shape_cast %32 : vector<1x4x4x32xf32> to vector<4x4x32xf32>
    %34 = vector.shape_cast %33 : vector<4x4x32xf32> to vector<16x32xf32>
    %35 = arith.truncf %34 : vector<16x32xf32> to vector<16x32xbf16>
    %c0_33 = arith.constant 0 : index
    %c0_34 = arith.constant 0 : index
    %c0_35 = arith.constant 0 : index
    %36 = vector.load %arg4[%c0_33, %c0_34, %c0_35] : memref<16x32x32xbf16, #tpu.memory_space<vmem>>, vector<1x32x32xbf16>
    %37 = vector.shape_cast %36 : vector<1x32x32xbf16> to vector<32x32xbf16>
    %cst_36 = arith.constant dense<0.000000e+00> : vector<16x32xf32>
    %38 = tpu.matmul %35, %37, %cst_36 {dimension_numbers = #tpu.dot_dimension_numbers<[1], [0], [0], [1], [0, 0, 1, 1], [], []>} : vector<16x32xbf16>, vector<32x32xbf16>, vector<16x32xf32> -> vector<16x32xf32>
    %39 = arith.addf %31, %38 : vector<16x32xf32>
    %c1_37 = arith.constant 1 : index
    %c0_38 = arith.constant 0 : index
    %c0_39 = arith.constant 0 : index
    %c0_40 = arith.constant 0 : index
    %40 = vector.load %arg15[%c1_37, %c0_38, %c0_39, %c0_40] : memref<4x5x5x32xf32, #tpu.memory_space<vmem>>, vector<1x4x4x32xf32>
    %41 = vector.shape_cast %40 : vector<1x4x4x32xf32> to vector<4x4x32xf32>
    %42 = vector.shape_cast %41 : vector<4x4x32xf32> to vector<16x32xf32>
    %43 = arith.truncf %42 : vector<16x32xf32> to vector<16x32xbf16>
    %c1_41 = arith.constant 1 : index
    %c0_42 = arith.constant 0 : index
    %c0_43 = arith.constant 0 : index
    %44 = vector.load %arg4[%c1_41, %c0_42, %c0_43] : memref<16x32x32xbf16, #tpu.memory_space<vmem>>, vector<1x32x32xbf16>
    %45 = vector.shape_cast %44 : vector<1x32x32xbf16> to vector<32x32xbf16>
    %cst_44 = arith.constant dense<0.000000e+00> : vector<16x32xf32>
    %46 = tpu.matmul %43, %45, %cst_44 {dimension_numbers = #tpu.dot_dimension_numbers<[1], [0], [0], [1], [0, 0, 1, 1], [], []>} : vector<16x32xbf16>, vector<32x32xbf16>, vector<16x32xf32> -> vector<16x32xf32>
    %47 = arith.addf %39, %46 : vector<16x32xf32>
    %c0_45 = arith.constant 0 : index
    %c0_46 = arith.constant 0 : index
    %c1_47 = arith.constant 1 : index
    %c0_48 = arith.constant 0 : index
    %48 = vector.load %arg15[%c0_45, %c0_46, %c1_47, %c0_48] : memref<4x5x5x32xf32, #tpu.memory_space<vmem>>, vector<1x4x4x32xf32>
    %49 = vector.shape_cast %48 : vector<1x4x4x32xf32> to vector<4x4x32xf32>
    %50 = vector.shape_cast %49 : vector<4x4x32xf32> to vector<16x32xf32>
    %51 = arith.truncf %50 : vector<16x32xf32> to vector<16x32xbf16>
    %c2_49 = arith.constant 2 : index
    %c0_50 = arith.constant 0 : index
    %c0_51 = arith.constant 0 : index
    %52 = vector.load %arg4[%c2_49, %c0_50, %c0_51] : memref<16x32x32xbf16, #tpu.memory_space<vmem>>, vector<1x32x32xbf16>
    %53 = vector.shape_cast %52 : vector<1x32x32xbf16> to vector<32x32xbf16>
    %cst_52 = arith.constant dense<0.000000e+00> : vector<16x32xf32>
    %54 = tpu.matmul %51, %53, %cst_52 {dimension_numbers = #tpu.dot_dimension_numbers<[1], [0], [0], [1], [0, 0, 1, 1], [], []>} : vector<16x32xbf16>, vector<32x32xbf16>, vector<16x32xf32> -> vector<16x32xf32>
    %55 = arith.addf %47, %54 : vector<16x32xf32>
    %c1_53 = arith.constant 1 : index
    %c0_54 = arith.constant 0 : index
    %c1_55 = arith.constant 1 : index
    %c0_56 = arith.constant 0 : index
    %56 = vector.load %arg15[%c1_53, %c0_54, %c1_55, %c0_56] : memref<4x5x5x32xf32, #tpu.memory_space<vmem>>, vector<1x4x4x32xf32>
    %57 = vector.shape_cast %56 : vector<1x4x4x32xf32> to vector<4x4x32xf32>
    %58 = vector.shape_cast %57 : vector<4x4x32xf32> to vector<16x32xf32>
    %59 = arith.truncf %58 : vector<16x32xf32> to vector<16x32xbf16>
    %c3_57 = arith.constant 3 : index
    %c0_58 = arith.constant 0 : index
    %c0_59 = arith.constant 0 : index
    %60 = vector.load %arg4[%c3_57, %c0_58, %c0_59] : memref<16x32x32xbf16, #tpu.memory_space<vmem>>, vector<1x32x32xbf16>
    %61 = vector.shape_cast %60 : vector<1x32x32xbf16> to vector<32x32xbf16>
    %cst_60 = arith.constant dense<0.000000e+00> : vector<16x32xf32>
    %62 = tpu.matmul %59, %61, %cst_60 {dimension_numbers = #tpu.dot_dimension_numbers<[1], [0], [0], [1], [0, 0, 1, 1], [], []>} : vector<16x32xbf16>, vector<32x32xbf16>, vector<16x32xf32> -> vector<16x32xf32>
    %63 = arith.addf %55, %62 : vector<16x32xf32>
    %c2_61 = arith.constant 2 : index
    %c0_62 = arith.constant 0 : index
    %c0_63 = arith.constant 0 : index
    %c0_64 = arith.constant 0 : index
    %64 = vector.load %arg15[%c2_61, %c0_62, %c0_63, %c0_64] : memref<4x5x5x32xf32, #tpu.memory_space<vmem>>, vector<1x4x4x32xf32>
    %65 = vector.shape_cast %64 : vector<1x4x4x32xf32> to vector<4x4x32xf32>
    %66 = vector.shape_cast %65 : vector<4x4x32xf32> to vector<16x32xf32>
    %67 = arith.truncf %66 : vector<16x32xf32> to vector<16x32xbf16>
    %c4 = arith.constant 4 : index
    %c0_65 = arith.constant 0 : index
    %c0_66 = arith.constant 0 : index
    %68 = vector.load %arg4[%c4, %c0_65, %c0_66] : memref<16x32x32xbf16, #tpu.memory_space<vmem>>, vector<1x32x32xbf16>
    %69 = vector.shape_cast %68 : vector<1x32x32xbf16> to vector<32x32xbf16>
    %cst_67 = arith.constant dense<0.000000e+00> : vector<16x32xf32>
    %70 = tpu.matmul %67, %69, %cst_67 {dimension_numbers = #tpu.dot_dimension_numbers<[1], [0], [0], [1], [0, 0, 1, 1], [], []>} : vector<16x32xbf16>, vector<32x32xbf16>, vector<16x32xf32> -> vector<16x32xf32>
    %71 = arith.addf %63, %70 : vector<16x32xf32>
    %c3_68 = arith.constant 3 : index
    %c0_69 = arith.constant 0 : index
    %c0_70 = arith.constant 0 : index
    %c0_71 = arith.constant 0 : index
    %72 = vector.load %arg15[%c3_68, %c0_69, %c0_70, %c0_71] : memref<4x5x5x32xf32, #tpu.memory_space<vmem>>, vector<1x4x4x32xf32>
    %73 = vector.shape_cast %72 : vector<1x4x4x32xf32> to vector<4x4x32xf32>
    %74 = vector.shape_cast %73 : vector<4x4x32xf32> to vector<16x32xf32>
    %75 = arith.truncf %74 : vector<16x32xf32> to vector<16x32xbf16>
    %c5 = arith.constant 5 : index
    %c0_72 = arith.constant 0 : index
    %c0_73 = arith.constant 0 : index
    %76 = vector.load %arg4[%c5, %c0_72, %c0_73] : memref<16x32x32xbf16, #tpu.memory_space<vmem>>, vector<1x32x32xbf16>
    %77 = vector.shape_cast %76 : vector<1x32x32xbf16> to vector<32x32xbf16>
    %cst_74 = arith.constant dense<0.000000e+00> : vector<16x32xf32>
    %78 = tpu.matmul %75, %77, %cst_74 {dimension_numbers = #tpu.dot_dimension_numbers<[1], [0], [0], [1], [0, 0, 1, 1], [], []>} : vector<16x32xbf16>, vector<32x32xbf16>, vector<16x32xf32> -> vector<16x32xf32>
    %79 = arith.addf %71, %78 : vector<16x32xf32>
    %c2_75 = arith.constant 2 : index
    %c0_76 = arith.constant 0 : index
    %c1_77 = arith.constant 1 : index
    %c0_78 = arith.constant 0 : index
    %80 = vector.load %arg15[%c2_75, %c0_76, %c1_77, %c0_78] : memref<4x5x5x32xf32, #tpu.memory_space<vmem>>, vector<1x4x4x32xf32>
    %81 = vector.shape_cast %80 : vector<1x4x4x32xf32> to vector<4x4x32xf32>
    %82 = vector.shape_cast %81 : vector<4x4x32xf32> to vector<16x32xf32>
    %83 = arith.truncf %82 : vector<16x32xf32> to vector<16x32xbf16>
    %c6 = arith.constant 6 : index
    %c0_79 = arith.constant 0 : index
    %c0_80 = arith.constant 0 : index
    %84 = vector.load %arg4[%c6, %c0_79, %c0_80] : memref<16x32x32xbf16, #tpu.memory_space<vmem>>, vector<1x32x32xbf16>
    %85 = vector.shape_cast %84 : vector<1x32x32xbf16> to vector<32x32xbf16>
    %cst_81 = arith.constant dense<0.000000e+00> : vector<16x32xf32>
    %86 = tpu.matmul %83, %85, %cst_81 {dimension_numbers = #tpu.dot_dimension_numbers<[1], [0], [0], [1], [0, 0, 1, 1], [], []>} : vector<16x32xbf16>, vector<32x32xbf16>, vector<16x32xf32> -> vector<16x32xf32>
    %87 = arith.addf %79, %86 : vector<16x32xf32>
    %c3_82 = arith.constant 3 : index
    %c0_83 = arith.constant 0 : index
    %c1_84 = arith.constant 1 : index
    %c0_85 = arith.constant 0 : index
    %88 = vector.load %arg15[%c3_82, %c0_83, %c1_84, %c0_85] : memref<4x5x5x32xf32, #tpu.memory_space<vmem>>, vector<1x4x4x32xf32>
    %89 = vector.shape_cast %88 : vector<1x4x4x32xf32> to vector<4x4x32xf32>
    %90 = vector.shape_cast %89 : vector<4x4x32xf32> to vector<16x32xf32>
    %91 = arith.truncf %90 : vector<16x32xf32> to vector<16x32xbf16>
    %c7 = arith.constant 7 : index
    %c0_86 = arith.constant 0 : index
    %c0_87 = arith.constant 0 : index
    %92 = vector.load %arg4[%c7, %c0_86, %c0_87] : memref<16x32x32xbf16, #tpu.memory_space<vmem>>, vector<1x32x32xbf16>
    %93 = vector.shape_cast %92 : vector<1x32x32xbf16> to vector<32x32xbf16>
    %cst_88 = arith.constant dense<0.000000e+00> : vector<16x32xf32>
    %94 = tpu.matmul %91, %93, %cst_88 {dimension_numbers = #tpu.dot_dimension_numbers<[1], [0], [0], [1], [0, 0, 1, 1], [], []>} : vector<16x32xbf16>, vector<32x32xbf16>, vector<16x32xf32> -> vector<16x32xf32>
    %95 = arith.addf %87, %94 : vector<16x32xf32>
    %c0_89 = arith.constant 0 : index
    %c1_90 = arith.constant 1 : index
    %c0_91 = arith.constant 0 : index
    %c0_92 = arith.constant 0 : index
    %96 = vector.load %arg15[%c0_89, %c1_90, %c0_91, %c0_92] : memref<4x5x5x32xf32, #tpu.memory_space<vmem>>, vector<1x4x4x32xf32>
    %97 = vector.shape_cast %96 : vector<1x4x4x32xf32> to vector<4x4x32xf32>
    %98 = vector.shape_cast %97 : vector<4x4x32xf32> to vector<16x32xf32>
    %99 = arith.truncf %98 : vector<16x32xf32> to vector<16x32xbf16>
    %c8 = arith.constant 8 : index
    %c0_93 = arith.constant 0 : index
    %c0_94 = arith.constant 0 : index
    %100 = vector.load %arg4[%c8, %c0_93, %c0_94] : memref<16x32x32xbf16, #tpu.memory_space<vmem>>, vector<1x32x32xbf16>
    %101 = vector.shape_cast %100 : vector<1x32x32xbf16> to vector<32x32xbf16>
    %cst_95 = arith.constant dense<0.000000e+00> : vector<16x32xf32>
    %102 = tpu.matmul %99, %101, %cst_95 {dimension_numbers = #tpu.dot_dimension_numbers<[1], [0], [0], [1], [0, 0, 1, 1], [], []>} : vector<16x32xbf16>, vector<32x32xbf16>, vector<16x32xf32> -> vector<16x32xf32>
    %103 = arith.addf %95, %102 : vector<16x32xf32>
    %c1_96 = arith.constant 1 : index
    %c1_97 = arith.constant 1 : index
    %c0_98 = arith.constant 0 : index
    %c0_99 = arith.constant 0 : index
    %104 = vector.load %arg15[%c1_96, %c1_97, %c0_98, %c0_99] : memref<4x5x5x32xf32, #tpu.memory_space<vmem>>, vector<1x4x4x32xf32>
    %105 = vector.shape_cast %104 : vector<1x4x4x32xf32> to vector<4x4x32xf32>
    %106 = vector.shape_cast %105 : vector<4x4x32xf32> to vector<16x32xf32>
    %107 = arith.truncf %106 : vector<16x32xf32> to vector<16x32xbf16>
    %c9 = arith.constant 9 : index
    %c0_100 = arith.constant 0 : index
    %c0_101 = arith.constant 0 : index
    %108 = vector.load %arg4[%c9, %c0_100, %c0_101] : memref<16x32x32xbf16, #tpu.memory_space<vmem>>, vector<1x32x32xbf16>
    %109 = vector.shape_cast %108 : vector<1x32x32xbf16> to vector<32x32xbf16>
    %cst_102 = arith.constant dense<0.000000e+00> : vector<16x32xf32>
    %110 = tpu.matmul %107, %109, %cst_102 {dimension_numbers = #tpu.dot_dimension_numbers<[1], [0], [0], [1], [0, 0, 1, 1], [], []>} : vector<16x32xbf16>, vector<32x32xbf16>, vector<16x32xf32> -> vector<16x32xf32>
    %111 = arith.addf %103, %110 : vector<16x32xf32>
    %c0_103 = arith.constant 0 : index
    %c1_104 = arith.constant 1 : index
    %c1_105 = arith.constant 1 : index
    %c0_106 = arith.constant 0 : index
    %112 = vector.load %arg15[%c0_103, %c1_104, %c1_105, %c0_106] : memref<4x5x5x32xf32, #tpu.memory_space<vmem>>, vector<1x4x4x32xf32>
    %113 = vector.shape_cast %112 : vector<1x4x4x32xf32> to vector<4x4x32xf32>
    %114 = vector.shape_cast %113 : vector<4x4x32xf32> to vector<16x32xf32>
    %115 = arith.truncf %114 : vector<16x32xf32> to vector<16x32xbf16>
    %c10 = arith.constant 10 : index
    %c0_107 = arith.constant 0 : index
    %c0_108 = arith.constant 0 : index
    %116 = vector.load %arg4[%c10, %c0_107, %c0_108] : memref<16x32x32xbf16, #tpu.memory_space<vmem>>, vector<1x32x32xbf16>
    %117 = vector.shape_cast %116 : vector<1x32x32xbf16> to vector<32x32xbf16>
    %cst_109 = arith.constant dense<0.000000e+00> : vector<16x32xf32>
    %118 = tpu.matmul %115, %117, %cst_109 {dimension_numbers = #tpu.dot_dimension_numbers<[1], [0], [0], [1], [0, 0, 1, 1], [], []>} : vector<16x32xbf16>, vector<32x32xbf16>, vector<16x32xf32> -> vector<16x32xf32>
    %119 = arith.addf %111, %118 : vector<16x32xf32>
    %c1_110 = arith.constant 1 : index
    %c1_111 = arith.constant 1 : index
    %c1_112 = arith.constant 1 : index
    %c0_113 = arith.constant 0 : index
    %120 = vector.load %arg15[%c1_110, %c1_111, %c1_112, %c0_113] : memref<4x5x5x32xf32, #tpu.memory_space<vmem>>, vector<1x4x4x32xf32>
    %121 = vector.shape_cast %120 : vector<1x4x4x32xf32> to vector<4x4x32xf32>
    %122 = vector.shape_cast %121 : vector<4x4x32xf32> to vector<16x32xf32>
    %123 = arith.truncf %122 : vector<16x32xf32> to vector<16x32xbf16>
    %c11 = arith.constant 11 : index
    %c0_114 = arith.constant 0 : index
    %c0_115 = arith.constant 0 : index
    %124 = vector.load %arg4[%c11, %c0_114, %c0_115] : memref<16x32x32xbf16, #tpu.memory_space<vmem>>, vector<1x32x32xbf16>
    %125 = vector.shape_cast %124 : vector<1x32x32xbf16> to vector<32x32xbf16>
    %cst_116 = arith.constant dense<0.000000e+00> : vector<16x32xf32>
    %126 = tpu.matmul %123, %125, %cst_116 {dimension_numbers = #tpu.dot_dimension_numbers<[1], [0], [0], [1], [0, 0, 1, 1], [], []>} : vector<16x32xbf16>, vector<32x32xbf16>, vector<16x32xf32> -> vector<16x32xf32>
    %127 = arith.addf %119, %126 : vector<16x32xf32>
    %c2_117 = arith.constant 2 : index
    %c1_118 = arith.constant 1 : index
    %c0_119 = arith.constant 0 : index
    %c0_120 = arith.constant 0 : index
    %128 = vector.load %arg15[%c2_117, %c1_118, %c0_119, %c0_120] : memref<4x5x5x32xf32, #tpu.memory_space<vmem>>, vector<1x4x4x32xf32>
    %129 = vector.shape_cast %128 : vector<1x4x4x32xf32> to vector<4x4x32xf32>
    %130 = vector.shape_cast %129 : vector<4x4x32xf32> to vector<16x32xf32>
    %131 = arith.truncf %130 : vector<16x32xf32> to vector<16x32xbf16>
    %c12 = arith.constant 12 : index
    %c0_121 = arith.constant 0 : index
    %c0_122 = arith.constant 0 : index
    %132 = vector.load %arg4[%c12, %c0_121, %c0_122] : memref<16x32x32xbf16, #tpu.memory_space<vmem>>, vector<1x32x32xbf16>
    %133 = vector.shape_cast %132 : vector<1x32x32xbf16> to vector<32x32xbf16>
    %cst_123 = arith.constant dense<0.000000e+00> : vector<16x32xf32>
    %134 = tpu.matmul %131, %133, %cst_123 {dimension_numbers = #tpu.dot_dimension_numbers<[1], [0], [0], [1], [0, 0, 1, 1], [], []>} : vector<16x32xbf16>, vector<32x32xbf16>, vector<16x32xf32> -> vector<16x32xf32>
    %135 = arith.addf %127, %134 : vector<16x32xf32>
    %c3_124 = arith.constant 3 : index
    %c1_125 = arith.constant 1 : index
    %c0_126 = arith.constant 0 : index
    %c0_127 = arith.constant 0 : index
    %136 = vector.load %arg15[%c3_124, %c1_125, %c0_126, %c0_127] : memref<4x5x5x32xf32, #tpu.memory_space<vmem>>, vector<1x4x4x32xf32>
    %137 = vector.shape_cast %136 : vector<1x4x4x32xf32> to vector<4x4x32xf32>
    %138 = vector.shape_cast %137 : vector<4x4x32xf32> to vector<16x32xf32>
    %139 = arith.truncf %138 : vector<16x32xf32> to vector<16x32xbf16>
    %c13 = arith.constant 13 : index
    %c0_128 = arith.constant 0 : index
    %c0_129 = arith.constant 0 : index
    %140 = vector.load %arg4[%c13, %c0_128, %c0_129] : memref<16x32x32xbf16, #tpu.memory_space<vmem>>, vector<1x32x32xbf16>
    %141 = vector.shape_cast %140 : vector<1x32x32xbf16> to vector<32x32xbf16>
    %cst_130 = arith.constant dense<0.000000e+00> : vector<16x32xf32>
    %142 = tpu.matmul %139, %141, %cst_130 {dimension_numbers = #tpu.dot_dimension_numbers<[1], [0], [0], [1], [0, 0, 1, 1], [], []>} : vector<16x32xbf16>, vector<32x32xbf16>, vector<16x32xf32> -> vector<16x32xf32>
    %143 = arith.addf %135, %142 : vector<16x32xf32>
    %c2_131 = arith.constant 2 : index
    %c1_132 = arith.constant 1 : index
    %c1_133 = arith.constant 1 : index
    %c0_134 = arith.constant 0 : index
    %144 = vector.load %arg15[%c2_131, %c1_132, %c1_133, %c0_134] : memref<4x5x5x32xf32, #tpu.memory_space<vmem>>, vector<1x4x4x32xf32>
    %145 = vector.shape_cast %144 : vector<1x4x4x32xf32> to vector<4x4x32xf32>
    %146 = vector.shape_cast %145 : vector<4x4x32xf32> to vector<16x32xf32>
    %147 = arith.truncf %146 : vector<16x32xf32> to vector<16x32xbf16>
    %c14 = arith.constant 14 : index
    %c0_135 = arith.constant 0 : index
    %c0_136 = arith.constant 0 : index
    %148 = vector.load %arg4[%c14, %c0_135, %c0_136] : memref<16x32x32xbf16, #tpu.memory_space<vmem>>, vector<1x32x32xbf16>
    %149 = vector.shape_cast %148 : vector<1x32x32xbf16> to vector<32x32xbf16>
    %cst_137 = arith.constant dense<0.000000e+00> : vector<16x32xf32>
    %150 = tpu.matmul %147, %149, %cst_137 {dimension_numbers = #tpu.dot_dimension_numbers<[1], [0], [0], [1], [0, 0, 1, 1], [], []>} : vector<16x32xbf16>, vector<32x32xbf16>, vector<16x32xf32> -> vector<16x32xf32>
    %151 = arith.addf %143, %150 : vector<16x32xf32>
    %c3_138 = arith.constant 3 : index
    %c1_139 = arith.constant 1 : index
    %c1_140 = arith.constant 1 : index
    %c0_141 = arith.constant 0 : index
    %152 = vector.load %arg15[%c3_138, %c1_139, %c1_140, %c0_141] : memref<4x5x5x32xf32, #tpu.memory_space<vmem>>, vector<1x4x4x32xf32>
    %153 = vector.shape_cast %152 : vector<1x4x4x32xf32> to vector<4x4x32xf32>
    %154 = vector.shape_cast %153 : vector<4x4x32xf32> to vector<16x32xf32>
    %155 = arith.truncf %154 : vector<16x32xf32> to vector<16x32xbf16>
    %c15 = arith.constant 15 : index
    %c0_142 = arith.constant 0 : index
    %c0_143 = arith.constant 0 : index
    %156 = vector.load %arg4[%c15, %c0_142, %c0_143] : memref<16x32x32xbf16, #tpu.memory_space<vmem>>, vector<1x32x32xbf16>
    %157 = vector.shape_cast %156 : vector<1x32x32xbf16> to vector<32x32xbf16>
    %cst_144 = arith.constant dense<0.000000e+00> : vector<16x32xf32>
    %158 = tpu.matmul %155, %157, %cst_144 {dimension_numbers = #tpu.dot_dimension_numbers<[1], [0], [0], [1], [0, 0, 1, 1], [], []>} : vector<16x32xbf16>, vector<32x32xbf16>, vector<16x32xf32> -> vector<16x32xf32>
    %159 = arith.addf %151, %158 : vector<16x32xf32>
    %c0_145 = arith.constant 0 : index
    %c0_146 = arith.constant 0 : index
    %160 = vector.load %arg5[%c0_145, %c0_146] : memref<1x32xf32, #tpu.memory_space<vmem>>, vector<1x32xf32>
    %161 = vector.broadcast %160 : vector<1x32xf32> to vector<16x32xf32>
    %162 = arith.addf %159, %161 : vector<16x32xf32>
    %cst_147 = arith.constant 0.000000e+00 : f32
    %163 = vector.broadcast %cst_147 : f32 to vector<16x32xf32>
    %164 = arith.maximumf %162, %163 : vector<16x32xf32>
    %165 = vector.shape_cast %164 : vector<16x32xf32> to vector<4x4x32xf32>
    %c1_148 = arith.constant 1 : index
    %c1_149 = arith.constant 1 : index
    %c0_150 = arith.constant 0 : index
    %166 = vector.load %arg16[%c1_148, %c1_149, %c0_150] : memref<6x6x32xf32, #tpu.memory_space<vmem>>, vector<4x4x32xf32>
    tpu.vector_store %arg16[%c1_148, %c1_149, %c0_150], %165 {strides = array<i32>} : memref<6x6x32xf32, #tpu.memory_space<vmem>>, vector<4x4x32xf32>,
    %cst_151 = arith.constant 0.000000e+00 : f32
    %167 = vector.broadcast %cst_151 : f32 to vector<16x32xf32>
    %c0_152 = arith.constant 0 : index
    %c0_153 = arith.constant 0 : index
    %c0_154 = arith.constant 0 : index
    %168 = vector.load %arg16[%c0_152, %c0_153, %c0_154] : memref<6x6x32xf32, #tpu.memory_space<vmem>>, vector<4x4x32xf32>
    %169 = vector.shape_cast %168 : vector<4x4x32xf32> to vector<16x32xf32>
    %170 = arith.truncf %169 : vector<16x32xf32> to vector<16x32xbf16>
    %c0_155 = arith.constant 0 : index
    %c0_156 = arith.constant 0 : index
    %c0_157 = arith.constant 0 : index
    %171 = vector.load %arg6[%c0_155, %c0_156, %c0_157] : memref<9x32x32xbf16, #tpu.memory_space<vmem>>, vector<1x32x32xbf16>
    %172 = vector.shape_cast %171 : vector<1x32x32xbf16> to vector<32x32xbf16>
    %cst_158 = arith.constant dense<0.000000e+00> : vector<16x32xf32>
    %173 = tpu.matmul %170, %172, %cst_158 {dimension_numbers = #tpu.dot_dimension_numbers<[1], [0], [0], [1], [0, 0, 1, 1], [], []>} : vector<16x32xbf16>, vector<32x32xbf16>, vector<16x32xf32> -> vector<16x32xf32>
    %174 = arith.addf %167, %173 : vector<16x32xf32>
    %c0_159 = arith.constant 0 : index
    %c1_160 = arith.constant 1 : index
    %c0_161 = arith.constant 0 : index
    %175 = vector.load %arg16[%c0_159, %c1_160, %c0_161] : memref<6x6x32xf32, #tpu.memory_space<vmem>>, vector<4x4x32xf32>
    %176 = vector.shape_cast %175 : vector<4x4x32xf32> to vector<16x32xf32>
    %177 = arith.truncf %176 : vector<16x32xf32> to vector<16x32xbf16>
    %c1_162 = arith.constant 1 : index
    %c0_163 = arith.constant 0 : index
    %c0_164 = arith.constant 0 : index
    %178 = vector.load %arg6[%c1_162, %c0_163, %c0_164] : memref<9x32x32xbf16, #tpu.memory_space<vmem>>, vector<1x32x32xbf16>
    %179 = vector.shape_cast %178 : vector<1x32x32xbf16> to vector<32x32xbf16>
    %cst_165 = arith.constant dense<0.000000e+00> : vector<16x32xf32>
    %180 = tpu.matmul %177, %179, %cst_165 {dimension_numbers = #tpu.dot_dimension_numbers<[1], [0], [0], [1], [0, 0, 1, 1], [], []>} : vector<16x32xbf16>, vector<32x32xbf16>, vector<16x32xf32> -> vector<16x32xf32>
    %181 = arith.addf %174, %180 : vector<16x32xf32>
    %c0_166 = arith.constant 0 : index
    %c2_167 = arith.constant 2 : index
    %c0_168 = arith.constant 0 : index
    %182 = vector.load %arg16[%c0_166, %c2_167, %c0_168] : memref<6x6x32xf32, #tpu.memory_space<vmem>>, vector<4x4x32xf32>
    %183 = vector.shape_cast %182 : vector<4x4x32xf32> to vector<16x32xf32>
    %184 = arith.truncf %183 : vector<16x32xf32> to vector<16x32xbf16>
    %c2_169 = arith.constant 2 : index
    %c0_170 = arith.constant 0 : index
    %c0_171 = arith.constant 0 : index
    %185 = vector.load %arg6[%c2_169, %c0_170, %c0_171] : memref<9x32x32xbf16, #tpu.memory_space<vmem>>, vector<1x32x32xbf16>
    %186 = vector.shape_cast %185 : vector<1x32x32xbf16> to vector<32x32xbf16>
    %cst_172 = arith.constant dense<0.000000e+00> : vector<16x32xf32>
    %187 = tpu.matmul %184, %186, %cst_172 {dimension_numbers = #tpu.dot_dimension_numbers<[1], [0], [0], [1], [0, 0, 1, 1], [], []>} : vector<16x32xbf16>, vector<32x32xbf16>, vector<16x32xf32> -> vector<16x32xf32>
    %188 = arith.addf %181, %187 : vector<16x32xf32>
    %c1_173 = arith.constant 1 : index
    %c0_174 = arith.constant 0 : index
    %c0_175 = arith.constant 0 : index
    %189 = vector.load %arg16[%c1_173, %c0_174, %c0_175] : memref<6x6x32xf32, #tpu.memory_space<vmem>>, vector<4x4x32xf32>
    %190 = vector.shape_cast %189 : vector<4x4x32xf32> to vector<16x32xf32>
    %191 = arith.truncf %190 : vector<16x32xf32> to vector<16x32xbf16>
    %c3_176 = arith.constant 3 : index
    %c0_177 = arith.constant 0 : index
    %c0_178 = arith.constant 0 : index
    %192 = vector.load %arg6[%c3_176, %c0_177, %c0_178] : memref<9x32x32xbf16, #tpu.memory_space<vmem>>, vector<1x32x32xbf16>
    %193 = vector.shape_cast %192 : vector<1x32x32xbf16> to vector<32x32xbf16>
    %cst_179 = arith.constant dense<0.000000e+00> : vector<16x32xf32>
    %194 = tpu.matmul %191, %193, %cst_179 {dimension_numbers = #tpu.dot_dimension_numbers<[1], [0], [0], [1], [0, 0, 1, 1], [], []>} : vector<16x32xbf16>, vector<32x32xbf16>, vector<16x32xf32> -> vector<16x32xf32>
    %195 = arith.addf %188, %194 : vector<16x32xf32>
    %c1_180 = arith.constant 1 : index
    %c1_181 = arith.constant 1 : index
    %c0_182 = arith.constant 0 : index
    %196 = vector.load %arg16[%c1_180, %c1_181, %c0_182] : memref<6x6x32xf32, #tpu.memory_space<vmem>>, vector<4x4x32xf32>
    %197 = vector.shape_cast %196 : vector<4x4x32xf32> to vector<16x32xf32>
    %198 = arith.truncf %197 : vector<16x32xf32> to vector<16x32xbf16>
    %c4_183 = arith.constant 4 : index
    %c0_184 = arith.constant 0 : index
    %c0_185 = arith.constant 0 : index
    %199 = vector.load %arg6[%c4_183, %c0_184, %c0_185] : memref<9x32x32xbf16, #tpu.memory_space<vmem>>, vector<1x32x32xbf16>
    %200 = vector.shape_cast %199 : vector<1x32x32xbf16> to vector<32x32xbf16>
    %cst_186 = arith.constant dense<0.000000e+00> : vector<16x32xf32>
    %201 = tpu.matmul %198, %200, %cst_186 {dimension_numbers = #tpu.dot_dimension_numbers<[1], [0], [0], [1], [0, 0, 1, 1], [], []>} : vector<16x32xbf16>, vector<32x32xbf16>, vector<16x32xf32> -> vector<16x32xf32>
    %202 = arith.addf %195, %201 : vector<16x32xf32>
    %c1_187 = arith.constant 1 : index
    %c2_188 = arith.constant 2 : index
    %c0_189 = arith.constant 0 : index
    %203 = vector.load %arg16[%c1_187, %c2_188, %c0_189] : memref<6x6x32xf32, #tpu.memory_space<vmem>>, vector<4x4x32xf32>
    %204 = vector.shape_cast %203 : vector<4x4x32xf32> to vector<16x32xf32>
    %205 = arith.truncf %204 : vector<16x32xf32> to vector<16x32xbf16>
    %c5_190 = arith.constant 5 : index
    %c0_191 = arith.constant 0 : index
    %c0_192 = arith.constant 0 : index
    %206 = vector.load %arg6[%c5_190, %c0_191, %c0_192] : memref<9x32x32xbf16, #tpu.memory_space<vmem>>, vector<1x32x32xbf16>
    %207 = vector.shape_cast %206 : vector<1x32x32xbf16> to vector<32x32xbf16>
    %cst_193 = arith.constant dense<0.000000e+00> : vector<16x32xf32>
    %208 = tpu.matmul %205, %207, %cst_193 {dimension_numbers = #tpu.dot_dimension_numbers<[1], [0], [0], [1], [0, 0, 1, 1], [], []>} : vector<16x32xbf16>, vector<32x32xbf16>, vector<16x32xf32> -> vector<16x32xf32>
    %209 = arith.addf %202, %208 : vector<16x32xf32>
    %c2_194 = arith.constant 2 : index
    %c0_195 = arith.constant 0 : index
    %c0_196 = arith.constant 0 : index
    %210 = vector.load %arg16[%c2_194, %c0_195, %c0_196] : memref<6x6x32xf32, #tpu.memory_space<vmem>>, vector<4x4x32xf32>
    %211 = vector.shape_cast %210 : vector<4x4x32xf32> to vector<16x32xf32>
    %212 = arith.truncf %211 : vector<16x32xf32> to vector<16x32xbf16>
    %c6_197 = arith.constant 6 : index
    %c0_198 = arith.constant 0 : index
    %c0_199 = arith.constant 0 : index
    %213 = vector.load %arg6[%c6_197, %c0_198, %c0_199] : memref<9x32x32xbf16, #tpu.memory_space<vmem>>, vector<1x32x32xbf16>
    %214 = vector.shape_cast %213 : vector<1x32x32xbf16> to vector<32x32xbf16>
    %cst_200 = arith.constant dense<0.000000e+00> : vector<16x32xf32>
    %215 = tpu.matmul %212, %214, %cst_200 {dimension_numbers = #tpu.dot_dimension_numbers<[1], [0], [0], [1], [0, 0, 1, 1], [], []>} : vector<16x32xbf16>, vector<32x32xbf16>, vector<16x32xf32> -> vector<16x32xf32>
    %216 = arith.addf %209, %215 : vector<16x32xf32>
    %c2_201 = arith.constant 2 : index
    %c1_202 = arith.constant 1 : index
    %c0_203 = arith.constant 0 : index
    %217 = vector.load %arg16[%c2_201, %c1_202, %c0_203] : memref<6x6x32xf32, #tpu.memory_space<vmem>>, vector<4x4x32xf32>
    %218 = vector.shape_cast %217 : vector<4x4x32xf32> to vector<16x32xf32>
    %219 = arith.truncf %218 : vector<16x32xf32> to vector<16x32xbf16>
    %c7_204 = arith.constant 7 : index
    %c0_205 = arith.constant 0 : index
    %c0_206 = arith.constant 0 : index
    %220 = vector.load %arg6[%c7_204, %c0_205, %c0_206] : memref<9x32x32xbf16, #tpu.memory_space<vmem>>, vector<1x32x32xbf16>
    %221 = vector.shape_cast %220 : vector<1x32x32xbf16> to vector<32x32xbf16>
    %cst_207 = arith.constant dense<0.000000e+00> : vector<16x32xf32>
    %222 = tpu.matmul %219, %221, %cst_207 {dimension_numbers = #tpu.dot_dimension_numbers<[1], [0], [0], [1], [0, 0, 1, 1], [], []>} : vector<16x32xbf16>, vector<32x32xbf16>, vector<16x32xf32> -> vector<16x32xf32>
    %223 = arith.addf %216, %222 : vector<16x32xf32>
    %c2_208 = arith.constant 2 : index
    %c2_209 = arith.constant 2 : index
    %c0_210 = arith.constant 0 : index
    %224 = vector.load %arg16[%c2_208, %c2_209, %c0_210] : memref<6x6x32xf32, #tpu.memory_space<vmem>>, vector<4x4x32xf32>
    %225 = vector.shape_cast %224 : vector<4x4x32xf32> to vector<16x32xf32>
    %226 = arith.truncf %225 : vector<16x32xf32> to vector<16x32xbf16>
    %c8_211 = arith.constant 8 : index
    %c0_212 = arith.constant 0 : index
    %c0_213 = arith.constant 0 : index
    %227 = vector.load %arg6[%c8_211, %c0_212, %c0_213] : memref<9x32x32xbf16, #tpu.memory_space<vmem>>, vector<1x32x32xbf16>
    %228 = vector.shape_cast %227 : vector<1x32x32xbf16> to vector<32x32xbf16>
    %cst_214 = arith.constant dense<0.000000e+00> : vector<16x32xf32>
    %229 = tpu.matmul %226, %228, %cst_214 {dimension_numbers = #tpu.dot_dimension_numbers<[1], [0], [0], [1], [0, 0, 1, 1], [], []>} : vector<16x32xbf16>, vector<32x32xbf16>, vector<16x32xf32> -> vector<16x32xf32>
    %230 = arith.addf %223, %229 : vector<16x32xf32>
    %c0_215 = arith.constant 0 : index
    %c0_216 = arith.constant 0 : index
    %231 = vector.load %arg7[%c0_215, %c0_216] : memref<1x32xf32, #tpu.memory_space<vmem>>, vector<1x32xf32>
    %232 = vector.broadcast %231 : vector<1x32xf32> to vector<16x32xf32>
    %233 = arith.addf %230, %232 : vector<16x32xf32>
    %cst_217 = arith.constant 0.000000e+00 : f32
    %234 = vector.broadcast %cst_217 : f32 to vector<16x32xf32>
    %235 = arith.maximumf %233, %234 : vector<16x32xf32>
    %236 = arith.truncf %235 : vector<16x32xf32> to vector<16x32xbf16>
    %c0_218 = arith.constant 0 : index
    %c0_219 = arith.constant 0 : index
    %237 = vector.load %arg8[%c0_218, %c0_219] : memref<32x32xbf16, #tpu.memory_space<vmem>>, vector<32x32xbf16>
    %cst_220 = arith.constant dense<0.000000e+00> : vector<16x32xf32>
    %238 = tpu.matmul %236, %237, %cst_220 {dimension_numbers = #tpu.dot_dimension_numbers<[1], [0], [0], [1], [0, 0, 1, 1], [], []>} : vector<16x32xbf16>, vector<32x32xbf16>, vector<16x32xf32> -> vector<16x32xf32>
    %239 = arith.addf %162, %238 : vector<16x32xf32>
    %c0_221 = arith.constant 0 : index
    %c0_222 = arith.constant 0 : index
    %240 = vector.load %arg9[%c0_221, %c0_222] : memref<1x32xf32, #tpu.memory_space<vmem>>, vector<1x32xf32>
    %241 = vector.broadcast %240 : vector<1x32xf32> to vector<16x32xf32>
    %242 = arith.addf %239, %241 : vector<16x32xf32>
    %cst_223 = arith.constant 0.000000e+00 : f32
    %243 = vector.broadcast %cst_223 : f32 to vector<16x32xf32>
    %244 = arith.maximumf %242, %243 : vector<16x32xf32>
    %245 = vector.shape_cast %244 : vector<16x32xf32> to vector<4x4x32xf32>
    %c1_224 = arith.constant 1 : index
    %c1_225 = arith.constant 1 : index
    %c0_226 = arith.constant 0 : index
    %246 = vector.load %arg16[%c1_224, %c1_225, %c0_226] : memref<6x6x32xf32, #tpu.memory_space<vmem>>, vector<4x4x32xf32>
    tpu.vector_store %arg16[%c1_224, %c1_225, %c0_226], %245 {strides = array<i32>} : memref<6x6x32xf32, #tpu.memory_space<vmem>>, vector<4x4x32xf32>,
    %cst_227 = arith.constant 0.000000e+00 : f32
    %247 = vector.broadcast %cst_227 : f32 to vector<16x32xf32>
    %c0_228 = arith.constant 0 : index
    %c0_229 = arith.constant 0 : index
    %c0_230 = arith.constant 0 : index
    %248 = vector.load %arg16[%c0_228, %c0_229, %c0_230] : memref<6x6x32xf32, #tpu.memory_space<vmem>>, vector<4x4x32xf32>
    %249 = vector.shape_cast %248 : vector<4x4x32xf32> to vector<16x32xf32>
    %250 = arith.truncf %249 : vector<16x32xf32> to vector<16x32xbf16>
    %c0_231 = arith.constant 0 : index
    %c0_232 = arith.constant 0 : index
    %c0_233 = arith.constant 0 : index
    %251 = vector.load %arg10[%c0_231, %c0_232, %c0_233] : memref<9x32x32xbf16, #tpu.memory_space<vmem>>, vector<1x32x32xbf16>
    %252 = vector.shape_cast %251 : vector<1x32x32xbf16> to vector<32x32xbf16>
    %cst_234 = arith.constant dense<0.000000e+00> : vector<16x32xf32>
    %253 = tpu.matmul %250, %252, %cst_234 {dimension_numbers = #tpu.dot_dimension_numbers<[1], [0], [0], [1], [0, 0, 1, 1], [], []>} : vector<16x32xbf16>, vector<32x32xbf16>, vector<16x32xf32> -> vector<16x32xf32>
    %254 = arith.addf %247, %253 : vector<16x32xf32>
    %c0_235 = arith.constant 0 : index
    %c1_236 = arith.constant 1 : index
    %c0_237 = arith.constant 0 : index
    %255 = vector.load %arg16[%c0_235, %c1_236, %c0_237] : memref<6x6x32xf32, #tpu.memory_space<vmem>>, vector<4x4x32xf32>
    %256 = vector.shape_cast %255 : vector<4x4x32xf32> to vector<16x32xf32>
    %257 = arith.truncf %256 : vector<16x32xf32> to vector<16x32xbf16>
    %c1_238 = arith.constant 1 : index
    %c0_239 = arith.constant 0 : index
    %c0_240 = arith.constant 0 : index
    %258 = vector.load %arg10[%c1_238, %c0_239, %c0_240] : memref<9x32x32xbf16, #tpu.memory_space<vmem>>, vector<1x32x32xbf16>
    %259 = vector.shape_cast %258 : vector<1x32x32xbf16> to vector<32x32xbf16>
    %cst_241 = arith.constant dense<0.000000e+00> : vector<16x32xf32>
    %260 = tpu.matmul %257, %259, %cst_241 {dimension_numbers = #tpu.dot_dimension_numbers<[1], [0], [0], [1], [0, 0, 1, 1], [], []>} : vector<16x32xbf16>, vector<32x32xbf16>, vector<16x32xf32> -> vector<16x32xf32>
    %261 = arith.addf %254, %260 : vector<16x32xf32>
    %c0_242 = arith.constant 0 : index
    %c2_243 = arith.constant 2 : index
    %c0_244 = arith.constant 0 : index
    %262 = vector.load %arg16[%c0_242, %c2_243, %c0_244] : memref<6x6x32xf32, #tpu.memory_space<vmem>>, vector<4x4x32xf32>
    %263 = vector.shape_cast %262 : vector<4x4x32xf32> to vector<16x32xf32>
    %264 = arith.truncf %263 : vector<16x32xf32> to vector<16x32xbf16>
    %c2_245 = arith.constant 2 : index
    %c0_246 = arith.constant 0 : index
    %c0_247 = arith.constant 0 : index
    %265 = vector.load %arg10[%c2_245, %c0_246, %c0_247] : memref<9x32x32xbf16, #tpu.memory_space<vmem>>, vector<1x32x32xbf16>
    %266 = vector.shape_cast %265 : vector<1x32x32xbf16> to vector<32x32xbf16>
    %cst_248 = arith.constant dense<0.000000e+00> : vector<16x32xf32>
    %267 = tpu.matmul %264, %266, %cst_248 {dimension_numbers = #tpu.dot_dimension_numbers<[1], [0], [0], [1], [0, 0, 1, 1], [], []>} : vector<16x32xbf16>, vector<32x32xbf16>, vector<16x32xf32> -> vector<16x32xf32>
    %268 = arith.addf %261, %267 : vector<16x32xf32>
    %c1_249 = arith.constant 1 : index
    %c0_250 = arith.constant 0 : index
    %c0_251 = arith.constant 0 : index
    %269 = vector.load %arg16[%c1_249, %c0_250, %c0_251] : memref<6x6x32xf32, #tpu.memory_space<vmem>>, vector<4x4x32xf32>
    %270 = vector.shape_cast %269 : vector<4x4x32xf32> to vector<16x32xf32>
    %271 = arith.truncf %270 : vector<16x32xf32> to vector<16x32xbf16>
    %c3_252 = arith.constant 3 : index
    %c0_253 = arith.constant 0 : index
    %c0_254 = arith.constant 0 : index
    %272 = vector.load %arg10[%c3_252, %c0_253, %c0_254] : memref<9x32x32xbf16, #tpu.memory_space<vmem>>, vector<1x32x32xbf16>
    %273 = vector.shape_cast %272 : vector<1x32x32xbf16> to vector<32x32xbf16>
    %cst_255 = arith.constant dense<0.000000e+00> : vector<16x32xf32>
    %274 = tpu.matmul %271, %273, %cst_255 {dimension_numbers = #tpu.dot_dimension_numbers<[1], [0], [0], [1], [0, 0, 1, 1], [], []>} : vector<16x32xbf16>, vector<32x32xbf16>, vector<16x32xf32> -> vector<16x32xf32>
    %275 = arith.addf %268, %274 : vector<16x32xf32>
    %c1_256 = arith.constant 1 : index
    %c1_257 = arith.constant 1 : index
    %c0_258 = arith.constant 0 : index
    %276 = vector.load %arg16[%c1_256, %c1_257, %c0_258] : memref<6x6x32xf32, #tpu.memory_space<vmem>>, vector<4x4x32xf32>
    %277 = vector.shape_cast %276 : vector<4x4x32xf32> to vector<16x32xf32>
    %278 = arith.truncf %277 : vector<16x32xf32> to vector<16x32xbf16>
    %c4_259 = arith.constant 4 : index
    %c0_260 = arith.constant 0 : index
    %c0_261 = arith.constant 0 : index
    %279 = vector.load %arg10[%c4_259, %c0_260, %c0_261] : memref<9x32x32xbf16, #tpu.memory_space<vmem>>, vector<1x32x32xbf16>
    %280 = vector.shape_cast %279 : vector<1x32x32xbf16> to vector<32x32xbf16>
    %cst_262 = arith.constant dense<0.000000e+00> : vector<16x32xf32>
    %281 = tpu.matmul %278, %280, %cst_262 {dimension_numbers = #tpu.dot_dimension_numbers<[1], [0], [0], [1], [0, 0, 1, 1], [], []>} : vector<16x32xbf16>, vector<32x32xbf16>, vector<16x32xf32> -> vector<16x32xf32>
    %282 = arith.addf %275, %281 : vector<16x32xf32>
    %c1_263 = arith.constant 1 : index
    %c2_264 = arith.constant 2 : index
    %c0_265 = arith.constant 0 : index
    %283 = vector.load %arg16[%c1_263, %c2_264, %c0_265] : memref<6x6x32xf32, #tpu.memory_space<vmem>>, vector<4x4x32xf32>
    %284 = vector.shape_cast %283 : vector<4x4x32xf32> to vector<16x32xf32>
    %285 = arith.truncf %284 : vector<16x32xf32> to vector<16x32xbf16>
    %c5_266 = arith.constant 5 : index
    %c0_267 = arith.constant 0 : index
    %c0_268 = arith.constant 0 : index
    %286 = vector.load %arg10[%c5_266, %c0_267, %c0_268] : memref<9x32x32xbf16, #tpu.memory_space<vmem>>, vector<1x32x32xbf16>
    %287 = vector.shape_cast %286 : vector<1x32x32xbf16> to vector<32x32xbf16>
    %cst_269 = arith.constant dense<0.000000e+00> : vector<16x32xf32>
    %288 = tpu.matmul %285, %287, %cst_269 {dimension_numbers = #tpu.dot_dimension_numbers<[1], [0], [0], [1], [0, 0, 1, 1], [], []>} : vector<16x32xbf16>, vector<32x32xbf16>, vector<16x32xf32> -> vector<16x32xf32>
    %289 = arith.addf %282, %288 : vector<16x32xf32>
    %c2_270 = arith.constant 2 : index
    %c0_271 = arith.constant 0 : index
    %c0_272 = arith.constant 0 : index
    %290 = vector.load %arg16[%c2_270, %c0_271, %c0_272] : memref<6x6x32xf32, #tpu.memory_space<vmem>>, vector<4x4x32xf32>
    %291 = vector.shape_cast %290 : vector<4x4x32xf32> to vector<16x32xf32>
    %292 = arith.truncf %291 : vector<16x32xf32> to vector<16x32xbf16>
    %c6_273 = arith.constant 6 : index
    %c0_274 = arith.constant 0 : index
    %c0_275 = arith.constant 0 : index
    %293 = vector.load %arg10[%c6_273, %c0_274, %c0_275] : memref<9x32x32xbf16, #tpu.memory_space<vmem>>, vector<1x32x32xbf16>
    %294 = vector.shape_cast %293 : vector<1x32x32xbf16> to vector<32x32xbf16>
    %cst_276 = arith.constant dense<0.000000e+00> : vector<16x32xf32>
    %295 = tpu.matmul %292, %294, %cst_276 {dimension_numbers = #tpu.dot_dimension_numbers<[1], [0], [0], [1], [0, 0, 1, 1], [], []>} : vector<16x32xbf16>, vector<32x32xbf16>, vector<16x32xf32> -> vector<16x32xf32>
    %296 = arith.addf %289, %295 : vector<16x32xf32>
    %c2_277 = arith.constant 2 : index
    %c1_278 = arith.constant 1 : index
    %c0_279 = arith.constant 0 : index
    %297 = vector.load %arg16[%c2_277, %c1_278, %c0_279] : memref<6x6x32xf32, #tpu.memory_space<vmem>>, vector<4x4x32xf32>
    %298 = vector.shape_cast %297 : vector<4x4x32xf32> to vector<16x32xf32>
    %299 = arith.truncf %298 : vector<16x32xf32> to vector<16x32xbf16>
    %c7_280 = arith.constant 7 : index
    %c0_281 = arith.constant 0 : index
    %c0_282 = arith.constant 0 : index
    %300 = vector.load %arg10[%c7_280, %c0_281, %c0_282] : memref<9x32x32xbf16, #tpu.memory_space<vmem>>, vector<1x32x32xbf16>
    %301 = vector.shape_cast %300 : vector<1x32x32xbf16> to vector<32x32xbf16>
    %cst_283 = arith.constant dense<0.000000e+00> : vector<16x32xf32>
    %302 = tpu.matmul %299, %301, %cst_283 {dimension_numbers = #tpu.dot_dimension_numbers<[1], [0], [0], [1], [0, 0, 1, 1], [], []>} : vector<16x32xbf16>, vector<32x32xbf16>, vector<16x32xf32> -> vector<16x32xf32>
    %303 = arith.addf %296, %302 : vector<16x32xf32>
    %c2_284 = arith.constant 2 : index
    %c2_285 = arith.constant 2 : index
    %c0_286 = arith.constant 0 : index
    %304 = vector.load %arg16[%c2_284, %c2_285, %c0_286] : memref<6x6x32xf32, #tpu.memory_space<vmem>>, vector<4x4x32xf32>
    %305 = vector.shape_cast %304 : vector<4x4x32xf32> to vector<16x32xf32>
    %306 = arith.truncf %305 : vector<16x32xf32> to vector<16x32xbf16>
    %c8_287 = arith.constant 8 : index
    %c0_288 = arith.constant 0 : index
    %c0_289 = arith.constant 0 : index
    %307 = vector.load %arg10[%c8_287, %c0_288, %c0_289] : memref<9x32x32xbf16, #tpu.memory_space<vmem>>, vector<1x32x32xbf16>
    %308 = vector.shape_cast %307 : vector<1x32x32xbf16> to vector<32x32xbf16>
    %cst_290 = arith.constant dense<0.000000e+00> : vector<16x32xf32>
    %309 = tpu.matmul %306, %308, %cst_290 {dimension_numbers = #tpu.dot_dimension_numbers<[1], [0], [0], [1], [0, 0, 1, 1], [], []>} : vector<16x32xbf16>, vector<32x32xbf16>, vector<16x32xf32> -> vector<16x32xf32>
    %310 = arith.addf %303, %309 : vector<16x32xf32>
    %c0_291 = arith.constant 0 : index
    %c0_292 = arith.constant 0 : index
    %311 = vector.load %arg11[%c0_291, %c0_292] : memref<1x32xf32, #tpu.memory_space<vmem>>, vector<1x32xf32>
    %312 = vector.broadcast %311 : vector<1x32xf32> to vector<16x32xf32>
    %313 = arith.addf %310, %312 : vector<16x32xf32>
    %cst_293 = arith.constant 0.000000e+00 : f32
    %314 = vector.broadcast %cst_293 : f32 to vector<16x32xf32>
    %315 = arith.maximumf %313, %314 : vector<16x32xf32>
    %316 = arith.truncf %315 : vector<16x32xf32> to vector<16x32xbf16>
    %c0_294 = arith.constant 0 : index
    %c0_295 = arith.constant 0 : index
    %317 = vector.load %arg12[%c0_294, %c0_295] : memref<32x32xbf16, #tpu.memory_space<vmem>>, vector<32x32xbf16>
    %cst_296 = arith.constant dense<0.000000e+00> : vector<16x32xf32>
    %318 = tpu.matmul %316, %317, %cst_296 {dimension_numbers = #tpu.dot_dimension_numbers<[1], [0], [0], [1], [0, 0, 1, 1], [], []>} : vector<16x32xbf16>, vector<32x32xbf16>, vector<16x32xf32> -> vector<16x32xf32>
    %319 = arith.addf %242, %318 : vector<16x32xf32>
    %c0_297 = arith.constant 0 : index
    %c0_298 = arith.constant 0 : index
    %320 = vector.load %arg13[%c0_297, %c0_298] : memref<1x32xf32, #tpu.memory_space<vmem>>, vector<1x32xf32>
    %321 = vector.broadcast %320 : vector<1x32xf32> to vector<16x32xf32>
    %322 = arith.addf %319, %321 : vector<16x32xf32>
    %cst_299 = arith.constant 0.000000e+00 : f32
    %323 = vector.broadcast %cst_299 : f32 to vector<16x32xf32>
    %324 = arith.maximumf %322, %323 : vector<16x32xf32>
    %325 = vector.shape_cast %324 : vector<16x32xf32> to vector<4x4x32xf32>
    %c0_300 = arith.constant 0 : index
    %c0_301 = arith.constant 0 : index
    %c0_302 = arith.constant 0 : index
    %c0_303 = arith.constant 0 : index
    %326 = vector.load %arg14[%c0_300, %c0_301, %c0_302, %c0_303] : memref<1x4x4x32xf32, #tpu.memory_space<vmem>>, vector<1x4x4x32xf32>
    %327 = vector.shape_cast %326 : vector<1x4x4x32xf32> to vector<4x4x32xf32>
    %328 = vector.shape_cast %325 : vector<4x4x32xf32> to vector<1x4x4x32xf32>
    tpu.vector_store %arg14[%c0_300, %c0_301, %c0_302, %c0_303], %328 {strides = array<i32>} : memref<1x4x4x32xf32, #tpu.memory_space<vmem>>, vector<1x4x4x32xf32>,
    return
  }
  func.func @transform_0(%arg0: i32) -> (i32, i32, i32) {
    %c0_i32 = arith.constant 0 : i32
    %c0_i32_0 = arith.constant 0 : i32
    %c0_i32_1 = arith.constant 0 : i32
    return %arg0, %c0_i32, %c0_i32_0 : i32, i32, i32
  }
  func.func @transform_1(%arg0: i32) -> (i32, i32) {
    %c0_i32 = arith.constant 0 : i32
    %c0_i32_0 = arith.constant 0 : i32
    %c0_i32_1 = arith.constant 0 : i32
    return %c0_i32, %c0_i32_0 : i32, i32
  }
  func.func @transform_2(%arg0: i32) -> (i32, i32) {
    %c0_i32 = arith.constant 0 : i32
    %c0_i32_0 = arith.constant 0 : i32
    %c0_i32_1 = arith.constant 0 : i32
    return %c0_i32, %c0_i32_0 : i32, i32
  }
  func.func @transform_3(%arg0: i32) -> (i32, i32, i32) {
    %c0_i32 = arith.constant 0 : i32
    %c0_i32_0 = arith.constant 0 : i32
    %c0_i32_1 = arith.constant 0 : i32
    %c0_i32_2 = arith.constant 0 : i32
    return %c0_i32, %c0_i32_0, %c0_i32_1 : i32, i32, i32
  }
  func.func @transform_4(%arg0: i32) -> (i32, i32) {
    %c0_i32 = arith.constant 0 : i32
    %c0_i32_0 = arith.constant 0 : i32
    %c0_i32_1 = arith.constant 0 : i32
    return %c0_i32, %c0_i32_0 : i32, i32
  }
  func.func @transform_5(%arg0: i32) -> (i32, i32, i32) {
    %c0_i32 = arith.constant 0 : i32
    %c0_i32_0 = arith.constant 0 : i32
    %c0_i32_1 = arith.constant 0 : i32
    %c0_i32_2 = arith.constant 0 : i32
    return %c0_i32, %c0_i32_0, %c0_i32_1 : i32, i32, i32
  }
  func.func @transform_6(%arg0: i32) -> (i32, i32) {
    %c0_i32 = arith.constant 0 : i32
    %c0_i32_0 = arith.constant 0 : i32
    %c0_i32_1 = arith.constant 0 : i32
    return %c0_i32, %c0_i32_0 : i32, i32
  }
  func.func @transform_7(%arg0: i32) -> (i32, i32) {
    %c0_i32 = arith.constant 0 : i32
    %c0_i32_0 = arith.constant 0 : i32
    %c0_i32_1 = arith.constant 0 : i32
    return %c0_i32, %c0_i32_0 : i32, i32
  }
  func.func @transform_8(%arg0: i32) -> (i32, i32) {
    %c0_i32 = arith.constant 0 : i32
    %c0_i32_0 = arith.constant 0 : i32
    %c0_i32_1 = arith.constant 0 : i32
    return %c0_i32, %c0_i32_0 : i32, i32
  }
  func.func @transform_9(%arg0: i32) -> (i32, i32, i32) {
    %c0_i32 = arith.constant 0 : i32
    %c0_i32_0 = arith.constant 0 : i32
    %c0_i32_1 = arith.constant 0 : i32
    %c0_i32_2 = arith.constant 0 : i32
    return %c0_i32, %c0_i32_0, %c0_i32_1 : i32, i32, i32
  }
  func.func @transform_10(%arg0: i32) -> (i32, i32) {
    %c0_i32 = arith.constant 0 : i32
    %c0_i32_0 = arith.constant 0 : i32
    %c0_i32_1 = arith.constant 0 : i32
    return %c0_i32, %c0_i32_0 : i32, i32
  }
  func.func @transform_11(%arg0: i32) -> (i32, i32) {
    %c0_i32 = arith.constant 0 : i32
    %c0_i32_0 = arith.constant 0 : i32
    %c0_i32_1 = arith.constant 0 : i32
    return %c0_i32, %c0_i32_0 : i32, i32
  }
  func.func @transform_12(%arg0: i32) -> (i32, i32) {
    %c0_i32 = arith.constant 0 : i32
    %c0_i32_0 = arith.constant 0 : i32
    %c0_i32_1 = arith.constant 0 : i32
    return %c0_i32, %c0_i32_0 : i32, i32
  }
  func.func @transform_13(%arg0: i32) -> (i32, i32, i32, i32) {
    %c0_i32 = arith.constant 0 : i32
    %c0_i32_0 = arith.constant 0 : i32
    %c0_i32_1 = arith.constant 0 : i32
    %c0_i32_2 = arith.constant 0 : i32
    return %arg0, %c0_i32, %c0_i32_0, %c0_i32_1 : i32, i32, i32, i32
  }
}

</mosaic_0001>

<bundles_post_ra>
// kernel: tpu_custom_call.1
= control target key start
LH: loop header
LB: loop body
LE: loop exit
PB: predicated region body
PF: predicated region fallthrough
CT: control target
= control target key end

     0   :  { %s5288_s0 = inlined_call_operand.hbm [shape: bf16[2,64,64], index: 0, kind: input, shape index: {}]   ;;  %s5289_s1 = inlined_call_operand.vmem [shape: bf16[64,32], index: 1, kind: input, shape index: {}]   ;;  %s5290_s2 = inlined_call_operand.vmem [shape: f32[1,32], index: 2, kind: input, shape index: {}]   ;;  %s5291_s3 = inlined_call_operand.hbm [shape: bf16[16,32,32], index: 3, kind: input, shape index: {}]   ;;  %s5292_s4 = inlined_call_operand.vmem [shape: f32[1,32], index: 4, kind: input, shape index: {}]   ;;  %s5293_s5 = inlined_call_operand.hbm [shape: bf16[9,32,32], index: 5, kind: input, shape index: {}]   ;;  %s5294_s6 = inlined_call_operand.vmem [shape: f32[1,32], index: 6, kind: input, shape index: {}]   ;;  %s5295_s7 = inlined_call_operand.vmem [shape: bf16[32,32], index: 7, kind: input, shape index: {}]   ;;  %s5296_s8 = inlined_call_operand.vmem [shape: f32[1,32], index: 8, kind: input, shape index: {}]   ;;  %s5297_s9 = inlined_call_operand.hbm [shape: bf16[9,32,32], index: 9, kind: input, shape index: {}]   ;;  %s5298_s10 = inlined_call_operand.vmem [shape: f32[1,32], index: 10, kind: input, shape index: {}]   ;;  %s5299_s11 = inlined_call_operand.vmem [shape: bf16[32,32], index: 11, kind: input, shape index: {}]   ;;  %s5300_s12 = inlined_call_operand.vmem [shape: f32[1,32], index: 12, kind: input, shape index: {}]   ;;  %s5301_s13 = inlined_call_operand.hbm [shape: f32[2,4,4,32], index: 13, kind: output, shape index: {}]  }
   0x1   :  { %5309 = sst [smem:[#allocation19_spill]] %s5296_s8 }
   0x2   :  { %5310 = sst [smem:[#allocation20_spill]] %s5298_s10 }
   0x3   :  { %5311 = sst [smem:[#allocation21_spill]] %s5299_s11 }
   0x4   :  { %5312 = sst [smem:[#allocation22_spill]] %s5300_s12 }
   0x5   :  { %5313 = sst [smem:[#allocation23_spill]] %s5301_s13 }
   0x6   :  { %18 = vsyncpa [#allocation5], 0 }
   0x7   :  { %20 = vsyncpa [#allocation5 + $0x1], 0 }
   0x8   :  { %21 = vsyncpa [#allocation8], 0 }
   0x9   :  { %22 = vsyncpa [#allocation11], 0 }
   0xa   :  { %23 = vsyncpa [#allocation6], 0 }
   0xb   :  { %25 = vsyncpa [#allocation6 + $0x1], 0  ;;  %s4694_s25 = smov 0   ;;  %s4696_s26 = smov 0  }
   0xc   :  { %s4698_s27 = smov 0   ;;  %s4700_s28 = smov 0  }
   0xd LB: > { %5314 = sst [smem:[#allocation17_spill]] %s4599_s25  ;;  %s4715_s29 = sadd.s32 4294967295, %s4611_s28   ;;  %s4611_s28 = sphi %s4700_s28, %s5342_s28   ;;  %s4607_s27 = sphi %s4698_s27, %s5341_s27   ;;  %s4603_s26 = sphi %s4696_s26, %s5340_s26   ;;  %s4599_s25 = sphi %s4694_s25, %s5339_s25  }
   0xe   : > { %s3624_s30 = sadd.s32 4294967294, %s4611_s28   ;;  %p51_p0 = scmp.ne.s32.totalorder %s4603_s26, %s4599_s25 }
   0xf   : > { %p5305_p1 = scmp.eq.s32.totalorder %s4715_s29, 0  ;;  %p333_p3 = scmp.eq.s32.totalorder %s3624_s30, 1 }
  0x10   : > { %p3625_p5 = scmp.ge.s32.totalorder %s4611_s28, 1  ;;  %p340_p7 = scmp.lt.s32.totalorder %s4611_s28, 3 }
  0x11   : > { %p4724_p4 = por %p5305_p1, %p51_p0  ;;  %p4729_p6 = por %p333_p3, %p51_p0 }
  0x12   : > { %p4734_p8 = pnand %p3625_p5, %p340_p7  ;;  %s4613_s17 = smov [#allocation7]  }
  0x13   : > { %s5315_s14 = scalar_select %p4724_p4, 1, 0 }
  0x14   : > { %s5316_s15 = scalar_select %p4729_p6, 1, 0 }
  0x15   : > { %s5318_s16 = scalar_select %p4734_p8, 1, 0 }
  0x16   : > { %5317 = sst [smem:[#allocation18_spill]] %s5316_s15  ;;  %s358_s18 = sshll.u32 %s4613_s17, 4  ;;  %s4738_s18 = int_to_ptr.vmem [resolvable:$true] %s358_s18 }
  0x17   : > { %p4208_p9 = pneg %p4734_p8  ;;  %s4614_s20 = smov [#allocation9]  }
  0x18   : > { %s374_s21 = sshll.u32 %s4614_s20, 4  ;;  %s4615_s22 = smov [#allocation10]   ;;  %s4749_s21 = int_to_ptr.vmem [resolvable:$true] %s374_s21 }
  0x19   : > { %p4745_p11 = pnand %p4208_p9, %p5305_p1  ;;  %s4751_s23 = sshll.u32 %s4615_s22, 4  ;;  %s397_s23 = int_to_ptr.vmem [resolvable:$true] %s4751_s23 }
  0x1a   : > { %s4423_s17 = scalar_lea.hbm %s5291_s3, 4096 }
  0x1b   : > { %p4424_p12 = scmp.ne.s32.totalorder %s5291_s3, %s4423_s17  ;;  %p4761_p13 = pneg %p4745_p11 }
  0x1c   : > { %p4430_p5 = scmp.lt.u32.totalorder %s4423_s17, %s5291_s3 }
  0x1d   : > { %p4426_p0 = pnand %p4761_p13, %p4424_p12 }
  0x1f   : > { %p4427_p3 = pneg %p4426_p0 }
  0x21   : > { %p4432_p7 = pnand %p4430_p5, %p4427_p3 }
  0x23   : > { %4435 = shalt.err (!%p4432_p7)
}
  0x24   : > { %s4436_s25 = scalar_lea.vmem %s4738_s18, 4096  ;;  %p4444_p2 = scmp.lt.s32.totalorder %s4738_s18, %s4738_s18 }
  0x25   : > { %p4437_p9 = scmp.ne.s32.totalorder %s4738_s18, %s4436_s25  ;;  %p4445_p6 = scmp.lt.s32.totalorder %s4436_s25, %s4436_s25 }
  0x27   : > { %p4439_p10 = pnand %p4437_p9, %p4761_p13  ;;  %p4446_p12 = por %p4445_p6, %p4444_p2 }
  0x29   : > { %p4440_p1 = pneg %p4439_p10 }
  0x2b   : > { %p4447_p0 = pnand %p4446_p12, %p4440_p1 }
  0x2d   : > { %4450 = shalt.err (!%p4447_p0)
}
  0x2e   : > { %s4616_s15 = smov 64   ;;  %s4617_s24 = smov 4  }
  0x2f   : > { %4211 = dma.hbm_to_vmem [thread:$0]  (!%p4745_p11), %s5291_s3, 4096, %s4738_s18, [#allocation8], %s4616_s15, %s4616_s15, %s4617_s24  }
  0x30   : > { %s4451_s25 = scalar_lea.hbm %s5293_s5, 2304 }
  0x31   : > { %p4452_p1 = scmp.ne.s32.totalorder %s5293_s5, %s4451_s25  ;;  %p4458_p10 = scmp.lt.u32.totalorder %s4451_s25, %s5293_s5 }
  0x33   : > { %p4454_p2 = pnand %p4452_p1, %p4761_p13 }
  0x35   : > { %p4455_p6 = pneg %p4454_p2 }
  0x37   : > { %p4460_p3 = pnand %p4458_p10, %p4455_p6 }
  0x39   : > { %4463 = shalt.err (!%p4460_p3)
}
  0x3a   : > { %s4464_s18 = scalar_lea.vmem %s4749_s21, 2304  ;;  %p4472_p12 = scmp.lt.s32.totalorder %s4749_s21, %s4749_s21 }
  0x3b   : > { %p4465_p5 = scmp.ne.s32.totalorder %s4749_s21, %s4464_s18  ;;  %p4473_p0 = scmp.lt.s32.totalorder %s4464_s18, %s4464_s18 }
  0x3d   : > { %p4467_p7 = pnand %p4465_p5, %p4761_p13  ;;  %p4474_p1 = por %p4473_p0, %p4472_p12 }
  0x3f   : > { %p4468_p9 = pneg %p4467_p7 }
  0x41   : > { %p4475_p2 = pnand %p4474_p1, %p4468_p9 }
  0x43   : > { %4478 = shalt.err (!%p4475_p2)
}
  0x44   : > { %4214 = dma.hbm_to_vmem [thread:$0]  (!%p4745_p11), %s5293_s5, 2304, %s4749_s21, [#allocation8], %s4616_s15, %s4616_s15, %s4617_s24  }
  0x45   : > { %s4479_s30 = scalar_lea.hbm %s5297_s9, 2304 }
  0x46   : > { %p4480_p6 = scmp.ne.s32.totalorder %s5297_s9, %s4479_s30  ;;  %p4486_p5 = scmp.lt.u32.totalorder %s4479_s30, %s5297_s9 }
  0x48   : > { %p4482_p10 = pnand %p4480_p6, %p4761_p13 }
  0x4a   : > { %p4483_p3 = pneg %p4482_p10 }
  0x4c   : > { %p4488_p7 = pnand %p4486_p5, %p4483_p3 }
  0x4e   : > { %4491 = shalt.err (!%p4488_p7)
}
  0x4f   : > { %s4492_s18 = scalar_lea.vmem %s397_s23, 2304  ;;  %p4500_p1 = scmp.lt.s32.totalorder %s397_s23, %s397_s23 }
  0x50   : > { %p4493_p9 = scmp.ne.s32.totalorder %s397_s23, %s4492_s18  ;;  %p4501_p2 = scmp.lt.s32.totalorder %s4492_s18, %s4492_s18 }
  0x52   : > { %p4495_p12 = pnand %p4493_p9, %p4761_p13  ;;  %p4502_p4 = por %p4501_p2, %p4500_p1 }
  0x54   : > { %p4496_p0 = pneg %p4495_p12 }
  0x56   : > { %p4503_p8 = pnand %p4502_p4, %p4496_p0 }
  0x58   : > { %4506 = shalt.err (!%p4503_p8)
}
  0x59   : > { %4217 = dma.hbm_to_vmem [thread:$0]  (!%p4745_p11), %s5297_s9, 2304, %s397_s23, [#allocation11], %s4616_s15, %s4616_s15, %s4617_s24  }
  0x5a   : > { %s4834_s13 = sadd.s32 1, %s4611_s28   ;;  %s38_s10 = sadd.s32 1, %s4607_s27 }
  0x5b   : > { %s35_s19 = ssub.s32 %s4611_s28, %s4834_s13  ;;  %p45_p8 = scmp.ne.s32.totalorder %s4607_s27, %s4603_s26 }
  0x5c   : > { %p36_p4 = scmp.eq.s32.totalorder %s35_s19, 0  ;;  %p46_p13 = scmp.eq.s32.totalorder %s4611_s28, 0 }
  0x5d   : > { %p4229_p6 = scmp.lt.s32.totalorder %s4611_s28, 2  ;;  %p5321_p3 = scmp.eq.s32.totalorder %s4715_s29, 1 }
  0x5e   : > { %s4844_s11 = scalar_select %p36_p4, %s4607_s27, %s38_s10  }
  0x5f   : > { %p47_p10 = por %p46_p13, %p45_p8  ;;  %p4848_p5 = por %p5321_p3, %p45_p8 }
  0x60   : > { %s419_s30 = sand.u32 1, %s4607_s27   ;;  %s3770_s17 = sshll.u32 %s4611_s28, 9 }
  0x61   : > { %s3630_s23 = sshll.u32 %s419_s30, 5  ;;  %s4857_s25 = scalar_lea.hbm %s5288_s0, %s3770_s17 }
  0x62   : > { %s423_s18 = scalar_lea.vmem [#allocation4], %s3630_s23  ;;  %p4859_p11 = pnand %p4229_p6, %p47_p10 }
  0x63   : > { %s430_s21 = sshll.u32 %s423_s18, 4  ;;  %s4865_s19 = scalar_lea.sflag [#allocation5], %s419_s30  ;;  %s4863_s21 = int_to_ptr.vmem [resolvable:$true] %s430_s21 }
  0x64   : > { %s4507_s10 = scalar_lea.hbm %s4857_s25, 512  ;;  %p4509_p9 = pneg %p4859_p11 }
  0x65   : > { %p4508_p7 = scmp.ne.s32.totalorder %s4857_s25, %s4507_s10  ;;  %s4512_s20 = scalar_lea.hbm %s5288_s0, 1024 }
  0x66   : > { %p4513_p1 = scmp.lt.u32.totalorder %s4857_s25, %s5288_s0  ;;  %p4514_p2 = scmp.lt.u32.totalorder %s4512_s20, %s4507_s10 }
  0x67   : > { %p4510_p12 = pnand %p4509_p9, %p4508_p7  ;;  %p4516_p8 = scmp.lt.u32.totalorder %s4507_s10, %s4857_s25 }
  0x68   : > { %p4515_p4 = por %p4514_p2, %p4513_p1 }
  0x69   : > { %p4511_p0 = pneg %p4510_p12 }
  0x6a   : > { %p4517_p13 = por %p4516_p8, %p4515_p4 }
  0x6c   : > { %p4518_p6 = pnand %p4517_p13, %p4511_p0 }
  0x6e   : > { %4521 = shalt.err (!%p4518_p6)
}
  0x6f   : > { %s4522_s30 = scalar_lea.vmem %s4863_s21, 512  ;;  %s4618_s17 = smov [#allocation4]  }
  0x70   : > { %p4523_p10 = scmp.ne.s32.totalorder %s4863_s21, %s4522_s30  ;;  %s4527_s23 = sshll.u32 %s4618_s17, 4  ;;  %s4528_s23 = int_to_ptr.vmem [resolvable:$false] %s4527_s23 }
  0x71   : > { %s4529_s22 = scalar_lea.vmem %s4528_s23, 1024  ;;  %p4530_p12 = scmp.lt.s32.totalorder %s4863_s21, %s4528_s23 }
  0x72   : > { %p4525_p3 = pnand %p4523_p10, %p4509_p9  ;;  %p4531_p1 = scmp.lt.s32.totalorder %s4529_s22, %s4522_s30 }
  0x74   : > { %p4526_p7 = pneg %p4525_p3  ;;  %p4532_p2 = por %p4531_p1, %p4530_p12 }
  0x76   : > { %p4533_p4 = pnand %p4532_p2, %p4526_p7 }
  0x78   : > { %4536 = shalt.err (!%p4533_p4)
}
  0x79   : > { %4221 = dma.hbm_to_vmem [thread:$0]  (!%p4859_p11), %s4857_s25, 512, %s4863_s21, %s4865_s19, %s4616_s15, %s4616_s15, %s4617_s24  }
  0x7a   : > { %p5324_p9 = scmp.ne.s32.totalorder %s5318_s16, 0 }
  0x7b   : > { %s4899_s10 = sand.u32 (!%p5324_p9), 1, %s4603_s26   ;;  %p5325_p0 = scmp.ne.s32.totalorder (!%p5324_p9), %s5315_s14, 0 }
  0x7c   : > { %442 = sbr.rel (%p5324_p9) target bundleno = 1662 (0x67e), region = 72  ;;  %s3634_s20 = sshll.u32 (!%p5324_p9), %s4899_s10, 5 }
  0x7d   : > { %s445_s18 = scalar_lea.sflag (!%p5324_p9), [#allocation5], %s4899_s10  ;;  %s4903_s30 = scalar_lea.vmem (!%p5324_p9), [#allocation4], %s3634_s20 }
  0x83   : > { %4582 = dma.done.wait (%p5325_p0), %s445_s18, 512  }
  0x84   : > { %4584 = vsyncadd (%p5325_p0), %s445_s18, 4294966784  ;;  %p5326_p11 = scmp.eq.s32.totalorder %s4715_s29, 0 }
  0x86   : > { %4586 = dma.done.wait (%p5326_p11), [#allocation8], 6400   ;;  %p5327_p8 = pmov %p5326_p11 }
  0x88   : > { %4588 = vsyncadd (%p5327_p8), [#allocation8], 4294960896  ;;  %p5328_p13 = pmov %p5327_p8 }
  0x89   : > { %p5329_p6 = pmov %p5327_p8 }
  0x8a   : > { %4590 = dma.done.wait (%p5328_p13), [#allocation11], 2304  }
  0x8b   : > { %4592 = vsyncadd (%p5329_p6), [#allocation11], 4294964992  ;;  %vm504_vm0 = vcmask 258048   ;;  %v4619_v0 = vmov 0.0   ;;  %v4275_v1 = vld [vmem:[%s5289_s1] sm:$0xff]   ;;  %v4276_v2 = vld [vmem:[%s5289_s1 + $0x8] sm:$0xff]  }
  0x8c   : > { %515 = vst.msk [vmem:[#allocation2 + $0x50] sm:$0x1f] %vm504_vm0, %v4619_v0  ;;  %516 = vst.msk [vmem:[#allocation2 + $0x58] sm:$0x1f] %vm504_vm0, %v4619_v0  ;;  %3904 = vmatprep.subr.bf16.mxu1 %v4619_v0  ;;  %3888 = vmatprep.subr.bf16.mxu0 %v4275_v1  ;;  %v4277_v3 = vld [vmem:[%s5289_s1 + $0x10] sm:$0xff]   ;;  %vm599_vm1 = vcmask 523264  }
  0x8d   : > { %505 = vst.msk [vmem:[#allocation2] sm:$0x1f] %vm504_vm0, %v4619_v0  ;;  %506 = vst.msk [vmem:[#allocation2 + $0x8] sm:$0x1f] %vm504_vm0, %v4619_v0  ;;  %3889 = vmatpush3.bf16.msra.mxu0 %v4275_v1  ;;  %v4279_v4 = vld [vmem:[%s4903_s30] sm:$0xff]   ;;  %v4278_v5 = vld [vmem:[%s5289_s1 + $0x18] sm:$0xff]  }
  0x8e   : > { %507 = vst.msk [vmem:[#allocation2 + $0x10] sm:$0x1f] %vm504_vm0, %v4619_v0  ;;  %508 = vst.msk [vmem:[#allocation2 + $0x18] sm:$0x1f] %vm504_vm0, %v4619_v0  ;;  %3890 = vmatprep.subr.bf16.mxu0 %v4276_v2  ;;  %3896 = vmatprep.mubr.msk.bf16.mxu0 %vm599_vm1, %v4279_v4  ;;  %v4280_v6 = vld [vmem:[%s4903_s30 + $0x8] sm:$0xff]   ;;  %v4281_v7 = vld [vmem:[%s4903_s30 + $0x10] sm:$0xff]  }
  0x8f   : > { %509 = vst.msk [vmem:[#allocation2 + $0x20] sm:$0x1f] %vm504_vm0, %v4619_v0  ;;  %510 = vst.msk [vmem:[#allocation2 + $0x28] sm:$0x1f] %vm504_vm0, %v4619_v0  ;;  %v4282_v8 = vld [vmem:[%s4903_s30 + $0x18] sm:$0xff]   ;;  %v4283_v9 = vld [vmem:[#allocation7 + $0x10] sm:$0xff]  }
  0x90   : > { %511 = vst.msk [vmem:[#allocation2 + $0x30] sm:$0x1f] %vm504_vm0, %v4619_v0  ;;  %512 = vst.msk [vmem:[#allocation2 + $0x38] sm:$0x1f] %vm504_vm0, %v4619_v0  ;;  %v4284_v10 = vld [vmem:[#allocation7 + $0x30] sm:$0xff]   ;;  %vm4620_vm2 = vmmov 0   ;;  %3905 = vmatpush3.bf16.msra.mxu1 %v4283_v9 }
  0x91   : > { %513 = vst.msk [vmem:[#allocation2 + $0x40] sm:$0x1f] %vm504_vm0, %v4619_v0  ;;  %514 = vst.msk [vmem:[#allocation2 + $0x48] sm:$0x1f] %vm504_vm0, %v4619_v0  ;;  %3891 = vmatpush3.bf16.msra.mxu0 %v4276_v2  ;;  %3908 = vmatprep.mubr.msk.bf16.mxu1 %vm4620_vm2, %v4619_v0  ;;  %v4285_v11 = vld [vmem:[#allocation7 + $0x18] sm:$0xff]   ;;  %vm684_vm3 = vcmask 257024  }
  0x92   : > { %517 = vst.msk [vmem:[#allocation2 + $0x60] sm:$0x1f] %vm504_vm0, %v4619_v0  ;;  %518 = vst.msk [vmem:[#allocation2 + $0x68] sm:$0x1f] %vm504_vm0, %v4619_v0  ;;  %3892 = vmatprep.subr.bf16.mxu0 %v4277_v3  ;;  %v4286_v12 = vld [vmem:[#allocation7 + $0x38] sm:$0xff]   ;;  %3906 = vmatprep.subr.bf16.mxu1 %v4619_v0  ;;  %vm770_vm4 = vcmask 261120  }
  0x93   : > { %519 = vst.msk [vmem:[#allocation2 + $0x70] sm:$0x1f] %vm504_vm0, %v4619_v0  ;;  %520 = vst.msk [vmem:[#allocation2 + $0x78] sm:$0x1f] %vm504_vm0, %v4619_v0  ;;  %v3639_v13 = vld [vmem:[%s5290_s2] ss:$0 sm:$0xff] }
  0x94   : > { %521 = vst.msk [vmem:[#allocation2 + $0x80] sm:$0x1f] %vm504_vm0, %v4619_v0  ;;  %522 = vst.msk [vmem:[#allocation2 + $0x88] sm:$0x1f] %vm504_vm0, %v4619_v0  ;;  %3907 = vmatpush3.bf16.msra.mxu1 %v4285_v11  ;;  %v4289_v39 = vld [vmem:[#allocation7] sm:$0xff]   ;;  %v4292_v44 = vld [vmem:[#allocation7 + $0x50] sm:$0xff]  }
  0x95   : > { %523 = vst.msk [vmem:[#allocation2 + $0x90] sm:$0x1f] %vm504_vm0, %v4619_v0  ;;  %524 = vst.msk [vmem:[#allocation2 + $0x98] sm:$0x1f] %vm504_vm0, %v4619_v0  ;;  %3893 = vmatpush3.bf16.msra.mxu0 %v4277_v3  ;;  %3912 = vmatprep.subr.bf16.mxu1 %v4619_v0  ;;  %v4293_v46 = vld [vmem:[#allocation7 + $0x8] sm:$0xff]   ;;  %v4294_v47 = vld [vmem:[#allocation7 + $0x58] sm:$0xff]  }
  0x96   : > { %3894 = vmatprep.subr.bf16.mxu0 %v4278_v5  ;;  %v4297_v49 = vld [vmem:[#allocation7 + $0x20] sm:$0xff]   ;;  %v4300_v54 = vld [vmem:[#allocation7 + $0x70] sm:$0xff]   ;;  %v4301_v56 = vld [vmem:[#allocation7 + $0x28] sm:$0xff]   ;;  %vm525_vm5 = vcmask 259072   ;;  %s5330_s8 = sld [smem:[#allocation19_spill]]  ;;  %s5331_s23 = sld [smem:[#allocation21_spill]] }
  0x97   : > { %v4302_v57 = vld [vmem:[#allocation7 + $0x78] sm:$0xff]   ;;  %v4305_v59 = vld [vmem:[#allocation7 + $0x40] sm:$0xff]   ;;  %v4308_v1 = vld [vmem:[#allocation7 + $0x90] sm:$0xff]   ;;  %527 = vst.msk [vmem:[#allocation3 + $0x8] sm:$0x3f] %vm525_vm5, %v4619_v0  ;;  %s5332_s14 = sld [smem:[#allocation20_spill]] }
  0x98   : > { %v4309_v3 = vld [vmem:[#allocation7 + $0x48] sm:$0xff]   ;;  %v4310_v4 = vld [vmem:[#allocation7 + $0x98] sm:$0xff]   ;;  %v4316_v11 = vld [vmem:[#allocation7 + $0xb0] sm:$0xff]   ;;  %528 = vst.msk [vmem:[#allocation3 + $0x10] sm:$0x3f] %vm525_vm5, %v4619_v0  ;;  %s3638_s16 = sshll.u32 %s4899_s10, 4 }
  0x99   : > { %3895 = vmatpush3.bf16.msra.mxu0 %v4278_v5  ;;  %529 = vst.msk [vmem:[#allocation3 + $0x18] sm:$0x3f] %vm525_vm5, %v4619_v0  ;;  %526 = vst.msk [vmem:[#allocation3] sm:$0x3f] %vm525_vm5, %v4619_v0  ;;  %s5333_s25 = sld [smem:[#allocation22_spill]]  ;;  %s502_s21 = scalar_lea.vmem [#allocation12], %s3638_s16 }
  0x9a   : > { %3928 = vmatprep.subr.bf16.mxu0 %v4619_v0  ;;  %530 = vst.msk [vmem:[#allocation3 + $0x20] sm:$0x3f] %vm525_vm5, %v4619_v0  ;;  %531 = vst.msk [vmem:[#allocation3 + $0x28] sm:$0x3f] %vm525_vm5, %v4619_v0  ;;  %s3771_s19 = sshll.u32 %s4715_s29, 8  ;;  %s5334_s20 = sld [smem:[#allocation23_spill]] }
  0x9b   : > { %s3509_s29 = scalar_lea.sflag [#allocation6], %s4899_s10 }
  0x9c   : > { %3897 = vmatmul.mubr.msk.bf16.vlgmr.msra.gmra.mrb[0].mxu0 %vm599_vm1, %v4280_v6 }
  0x9d   : > { %3900 = vmatprep.mubr.msk.bf16.mxu0 %vm599_vm1, %v4281_v7  ;;  %3929 = vmatpush3.bf16.msra.mxu0 %v4284_v10 }
  0x9e   : > { %3930 = vmatprep.subr.bf16.mxu0 %v4619_v0 }
  0xa0   : > { %s5241_s18 = scalar_lea.hbm %s5334_s20, %s3771_s19 }
  0xa1   : > { %3931 = vmatpush3.bf16.msra.mxu0 %v4286_v12 }
  0xa2   : > { %3944 = vmatprep.subr.bf16.mxu0 %v4619_v0 }
  0xa4   : > { %3901 = vmatmul.mubr.msk.bf16.gmra.mrb[4].mxu0 %vm599_vm1, %v4282_v8  ;;  %v4313_v8 = vld [vmem:[#allocation7 + $0x60] sm:$0xff]  }
  0xa5   : > { %3932 = vmatprep.mubr.msk.bf16.mxu0 %vm4620_vm2, %v4619_v0 }
 0x16f   : > { %v3898_v14 = vpop.f32.mrb[0].mxu0 }
 0x170   : > { %v655_v15 = vadd.f32 %v3898_v14, %v3639_v13  ;;  %v646_v16 = vpop.f32.mrb[1].mxu0  ;;  %v4318_v14 = vld [vmem:[#allocation7 + $0xb8] sm:$0xff]  }
 0x171   : > { %v647_v17 = vadd.f32 %v3639_v13, %v646_v16  ;;  %v3899_v18 = vpop.f32.mrb[2].mxu0 }
 0x172   : > { %v702_v19 = vcombine.high %v655_v15, %v655_v15  ;;  %707 = vst.msk [vmem:[#allocation2 + $0x51] sm:$0xf] %vm684_vm3, %v655_v15  ;;  %v658_v20 = vadd.f32 %v3899_v18, %v3639_v13  ;;  %v649_v21 = vpop.f32.mrb[3].mxu0  ;;  %v4321_v18 = vld [vmem:[#allocation7 + $0x80] sm:$0xff]  }
 0x173   : > { %v713_v22 = vcombine.high %v647_v17, %v647_v17  ;;  %718 = vst.msk [vmem:[#allocation2 + $0x78] sm:$0xf] %vm684_vm3, %v647_v17  ;;  %v650_v23 = vadd.f32 %v3639_v13, %v649_v21  ;;  %v4324_v21 = vld [vmem:[#allocation7 + $0xd0] sm:$0xff]  }
 0x174   : > { %708 = vst.msk [vmem:[#allocation2 + $0x59] sm:$0xf] %vm684_vm3, %v702_v19  ;;  %v703_v24 = vcombine.high %v658_v20, %v658_v20  ;;  %709 = vst.msk [vmem:[#allocation2 + $0x61] sm:$0xf] %vm684_vm3, %v658_v20 }
 0x175   : > { %719 = vst.msk [vmem:[#allocation2 + $0x80] sm:$0xf] %vm684_vm3, %v713_v22  ;;  %v714_v25 = vcombine.high %v650_v23, %v650_v23  ;;  %720 = vst.msk [vmem:[#allocation2 + $0x88] sm:$0xf] %vm684_vm3, %v650_v23  ;;  %v4325_v23 = vld [vmem:[#allocation7 + $0x88] sm:$0xff]  }
 0x176   : > { %710 = vst.msk [vmem:[#allocation2 + $0x69] sm:$0xf] %vm684_vm3, %v703_v24  ;;  %v4326_v24 = vld [vmem:[#allocation7 + $0xd8] sm:$0xff]  }
 0x177   : > { %721 = vst.msk [vmem:[#allocation2 + $0x90] sm:$0xf] %vm684_vm3, %v714_v25  ;;  %v3902_v26 = vpop.f32.mrb[4].mxu0 }
 0x178   : > { %v671_v27 = vadd.f32 %v3902_v26, %v3639_v13  ;;  %v662_v28 = vpop.f32.mrb[5].mxu0 }
 0x179   : > { %v663_v29 = vadd.f32 %v3639_v13, %v662_v28  ;;  %v3903_v30 = vpop.f32.mrb[6].mxu0  ;;  %v4329_v28 = vld [vmem:[#allocation7 + $0xa0] sm:$0xff]  }
 0x17a   : > { %v679_v31 = vcombine.high %v671_v27, %v671_v27  ;;  %685 = vst.msk [vmem:[#allocation2 + $0x9] sm:$0xf] %vm684_vm3, %v671_v27  ;;  %v674_v32 = vadd.f32 %v3903_v30, %v3639_v13  ;;  %v665_v33 = vpop.f32.mrb[7].mxu0 }
 0x17b   : > { %v691_v34 = vcombine.high %v663_v29, %v663_v29  ;;  %696 = vst.msk [vmem:[#allocation2 + $0x30] sm:$0xf] %vm684_vm3, %v663_v29  ;;  %v666_v35 = vadd.f32 %v3639_v13, %v665_v33  ;;  %v4311_v7 = vld [vmem:[#allocation2 + $0x50] ss:$8 sps:$4 sm:$0xff]  }
 0x17c   : > { %686 = vst.msk [vmem:[#allocation2 + $0x11] sm:$0xf] %vm684_vm3, %v679_v31  ;;  %v680_v36 = vcombine.high %v674_v32, %v674_v32  ;;  %687 = vst.msk [vmem:[#allocation2 + $0x19] sm:$0xf] %vm684_vm3, %v674_v32  ;;  %v4298_v52 = vld [vmem:[#allocation2 + $0x78] ss:$8 sps:$4 sm:$0xff]  }
 0x17d   : > { %697 = vst.msk [vmem:[#allocation2 + $0x38] sm:$0xf] %vm684_vm3, %v691_v34  ;;  %v692_v37 = vcombine.high %v666_v35, %v666_v35  ;;  %698 = vst.msk [vmem:[#allocation2 + $0x40] sm:$0xf] %vm684_vm3, %v666_v35  ;;  %v4306_v62 = vld [vmem:[#allocation2 + $0x79] ss:$8 sps:$4 sm:$0xff]  }
 0x17e   : > { %688 = vst.msk [vmem:[#allocation2 + $0x21] sm:$0xf] %vm684_vm3, %v680_v36  ;;  %v4299_v50 = vld [vmem:[#allocation2 + $0x88] ss:$8 sps:$4 sm:$0xff]   ;;  %v4317_v13 = vld [vmem:[#allocation7 + $0x68] sm:$0xff]   ;;  %v4332_v31 = vld [vmem:[#allocation7 + $0xf0] sm:$0xff]  }
 0x17f   : > { %699 = vst.msk [vmem:[#allocation2 + $0x48] sm:$0xf] %vm684_vm3, %v692_v37  ;;  %v1111_v55 = vpack.c.bf16 %v4299_v50, %v4298_v52  ;;  %v4307_v60 = vld [vmem:[#allocation2 + $0x89] ss:$8 sps:$4 sm:$0xff]   ;;  %v4333_v33 = vld [vmem:[#allocation7 + $0xa8] sm:$0xff]  }
 0x180   : > { %v1263_v2 = vpack.c.bf16 %v4307_v60, %v4306_v62  ;;  %v4312_v5 = vld [vmem:[#allocation2 + $0x60] ss:$8 sps:$4 sm:$0xff]   ;;  %v4319_v17 = vld [vmem:[#allocation2 + $0x51] ss:$8 sps:$4 sm:$0xff]  }
 0x181   : > { %v4295_v51 = vld [vmem:[#allocation2] ss:$8 sps:$4 sm:$0xff]   ;;  %v1035_v10 = vpack.c.bf16 %v4312_v5, %v4311_v7  ;;  %v4331_v26 = vld [vmem:[#allocation2 + $0x90] ss:$8 sps:$4 sm:$0xff]  }
 0x182   : > { %v4287_v38 = vld [vmem:[#allocation2 + $0x28] ss:$8 sps:$4 sm:$0xff]  }
 0x183   : > { %v4290_v40 = vld [vmem:[#allocation2 + $0x29] ss:$8 sps:$4 sm:$0xff]  }
 0x184   : > { %v4288_v41 = vld [vmem:[#allocation2 + $0x38] ss:$8 sps:$4 sm:$0xff]   ;;  %v4327_v27 = vld [vmem:[#allocation2 + $0x8] ss:$8 sps:$4 sm:$0xff]  }
 0x185   : > { %v4291_v42 = vld [vmem:[#allocation2 + $0x39] ss:$8 sps:$4 sm:$0xff]   ;;  %v752_v43 = vpack.c.bf16 %v4288_v41, %v4287_v38  ;;  %v4334_v34 = vld [vmem:[#allocation7 + $0xf8] sm:$0xff]   ;;  %v4337_v38 = vld [vmem:[#allocation7 + $0xc0] sm:$0xff]  }
 0x186   : > { %v959_v45 = vpack.c.bf16 %v4291_v42, %v4290_v40  ;;  %v4296_v48 = vld [vmem:[#allocation2 + $0x10] ss:$8 sps:$4 sm:$0xff]   ;;  %v4303_v61 = vld [vmem:[#allocation2 + $0x1] ss:$8 sps:$4 sm:$0xff]  }
 0x187   : > { %3909 = vmatmul.mubr.msk.bf16.vlgmr.msra.gmra.mrb[0].mxu1 %vm770_vm4, %v752_v43  ;;  %v734_v53 = vpack.c.bf16 %v4296_v48, %v4295_v51  ;;  %v4304_v58 = vld [vmem:[#allocation2 + $0x11] ss:$8 sps:$4 sm:$0xff]   ;;  %v4315_v6 = vld [vmem:[#allocation2 + $0x40] ss:$8 sps:$4 sm:$0xff]  }
 0x188   : > { %3913 = vmatpush3.bf16.msra.mxu1 %v4289_v39  ;;  %3933 = vmatmul.mubr.msk.bf16.vlgmr.msra.gmra.mrb[8].mxu0 %vm770_vm4, %v959_v45  ;;  %v883_v63 = vpack.c.bf16 %v4304_v58, %v4303_v61  ;;  %v4314_v9 = vld [vmem:[#allocation2 + $0x30] ss:$8 sps:$4 sm:$0xff]   ;;  %v4320_v15 = vld [vmem:[#allocation2 + $0x61] ss:$8 sps:$4 sm:$0xff]  }
 0x189   : > { %3945 = vmatpush3.bf16.msra.mxu0 %v4292_v44  ;;  %3914 = vmatprep.subr.bf16.mxu1 %v4619_v0  ;;  %v1415_v12 = vpack.c.bf16 %v4315_v6, %v4314_v9  ;;  %v4323_v16 = vld [vmem:[#allocation2 + $0x41] ss:$8 sps:$4 sm:$0xff]   ;;  %v4322_v19 = vld [vmem:[#allocation2 + $0x31] ss:$8 sps:$4 sm:$0xff]   ;;  %v1187_v20 = vpack.c.bf16 %v4320_v15, %v4319_v17 }
 0x18a   : > { %3946 = vmatprep.subr.bf16.mxu0 %v4619_v0  ;;  %3916 = vmatprep.mubr.msk.bf16.mxu1 %vm4620_vm2, %v4619_v0  ;;  %v1567_v22 = vpack.c.bf16 %v4323_v16, %v4322_v19  ;;  %v4328_v25 = vld [vmem:[#allocation2 + $0x18] ss:$8 sps:$4 sm:$0xff]   ;;  %v4335_v37 = vld [vmem:[#allocation2 + $0x9] ss:$8 sps:$4 sm:$0xff]  }
 0x18b   : > { %3948 = vmatprep.mubr.msk.bf16.mxu0 %vm4620_vm2, %v4619_v0  ;;  %v4330_v29 = vld [vmem:[#allocation2 + $0x80] ss:$8 sps:$4 sm:$0xff]   ;;  %v1339_v30 = vpack.c.bf16 %v4328_v25, %v4327_v27  ;;  %v4339_v36 = vld [vmem:[#allocation2 + $0x91] ss:$8 sps:$4 sm:$0xff]  }
 0x18c   : > { %3915 = vmatpush3.bf16.msra.mxu1 %v4293_v46  ;;  %v1721_v32 = vpack.c.bf16 %v4331_v26, %v4330_v29  ;;  %v4336_v35 = vld [vmem:[#allocation2 + $0x19] ss:$8 sps:$4 sm:$0xff]   ;;  %v4342_v43 = vld [vmem:[#allocation2 + $0x68] ss:$8 sps:$4 sm:$0xff]  }
 0x18d   : > { %3947 = vmatpush3.bf16.msra.mxu0 %v4294_v47  ;;  %3920 = vmatprep.subr.bf16.mxu1 %v4619_v0  ;;  %v4338_v39 = vld [vmem:[#allocation2 + $0x81] ss:$8 sps:$4 sm:$0xff]   ;;  %v1491_v40 = vpack.c.bf16 %v4336_v35, %v4335_v37  ;;  %v4340_v42 = vld [vmem:[#allocation7 + $0xc8] sm:$0xff]   ;;  %v4343_v45 = vld [vmem:[#allocation7 + $0xe0] sm:$0xff]  }
 0x18e   : > { %3960 = vmatprep.subr.bf16.mxu0 %v4619_v0  ;;  %v1873_v41 = vpack.c.bf16 %v4339_v36, %v4338_v39  ;;  %v4341_v44 = vld [vmem:[#allocation2 + $0x58] ss:$8 sps:$4 sm:$0xff]   ;;  %v4346_v48 = vld [vmem:[#allocation2 + $0x69] ss:$8 sps:$4 sm:$0xff]  }
 0x18f   : > { %3917 = vmatmul.mubr.msk.bf16.vlgmr.msra.gmra.mrb[4].mxu1 %vm770_vm4, %v734_v53  ;;  %v1644_v46 = vpack.c.bf16 %v4342_v43, %v4341_v44  ;;  %v4344_v47 = vld [vmem:[#allocation7 + $0xe8] sm:$0xff]   ;;  %v4347_v51 = vld [vmem:[#allocation9 + $0x10] sm:$0xff]   ;;  %v4348_v52 = vld [vmem:[#allocation9] sm:$0xff]  }
 0x190   : > { %3921 = vmatpush3.bf16.msra.mxu1 %v4297_v49  ;;  %3949 = vmatmul.mubr.msk.bf16.vlgmr.msra.gmra.mrb[12].mxu0 %vm770_vm4, %v1111_v55  ;;  %v4345_v49 = vld [vmem:[#allocation2 + $0x59] ss:$8 sps:$4 sm:$0xff]   ;;  %v4349_v53 = vld [vmem:[#allocation9 + $0x18] sm:$0xff]  }
 0x191   : > { %3961 = vmatpush3.bf16.msra.mxu0 %v4300_v54  ;;  %3922 = vmatprep.subr.bf16.mxu1 %v4619_v0  ;;  %v1797_v50 = vpack.c.bf16 %v4346_v48, %v4345_v49  ;;  %v4350_v54 = vld [vmem:[#allocation9 + $0x8] sm:$0xff]  }
 0x192   : > { %3962 = vmatprep.subr.bf16.mxu0 %v4619_v0  ;;  %3924 = vmatprep.mubr.msk.bf16.mxu1 %vm4620_vm2, %v4619_v0 }
 0x193   : > { %3964 = vmatprep.mubr.msk.bf16.mxu0 %vm4620_vm2, %v4619_v0 }
 0x194   : > { %3923 = vmatpush3.bf16.msra.mxu1 %v4301_v56 }
 0x195   : > { %3963 = vmatpush3.bf16.msra.mxu0 %v4302_v57  ;;  %3936 = vmatprep.subr.bf16.mxu1 %v4619_v0 }
 0x196   : > { %3976 = vmatprep.subr.bf16.mxu0 %v4619_v0 }
 0x197   : > { %3925 = vmatmul.mubr.msk.bf16.vlgmr.msra.gmra.mrb[8].mxu1 %vm770_vm4, %v883_v63 }
 0x198   : > { %3937 = vmatpush3.bf16.msra.mxu1 %v4305_v59  ;;  %3965 = vmatmul.mubr.msk.bf16.vlgmr.msra.gmra.mrb[16].mxu0 %vm770_vm4, %v1263_v2 }
 0x199   : > { %3977 = vmatpush3.bf16.msra.mxu0 %v4308_v1  ;;  %3938 = vmatprep.subr.bf16.mxu1 %v4619_v0 }
 0x19a   : > { %3978 = vmatprep.subr.bf16.mxu0 %v4619_v0  ;;  %3940 = vmatprep.mubr.msk.bf16.mxu1 %vm4620_vm2, %v4619_v0 }
 0x19b   : > { %3980 = vmatprep.mubr.msk.bf16.mxu0 %vm4620_vm2, %v4619_v0 }
 0x19c   : > { %3939 = vmatpush3.bf16.msra.mxu1 %v4309_v3 }
 0x19d   : > { %3979 = vmatpush3.bf16.msra.mxu0 %v4310_v4  ;;  %3952 = vmatprep.subr.bf16.mxu1 %v4619_v0 }
 0x19e   : > { %3992 = vmatprep.subr.bf16.mxu0 %v4619_v0 }
 0x19f   : > { %3941 = vmatmul.mubr.msk.bf16.vlgmr.msra.gmra.mrb[12].mxu1 %vm770_vm4, %v1035_v10 }
 0x1a0   : > { %3953 = vmatpush3.bf16.msra.mxu1 %v4313_v8  ;;  %3981 = vmatmul.mubr.msk.bf16.vlgmr.msra.gmra.mrb[20].mxu0 %vm770_vm4, %v1415_v12 }
 0x1a1   : > { %3993 = vmatpush3.bf16.msra.mxu0 %v4316_v11  ;;  %3954 = vmatprep.subr.bf16.mxu1 %v4619_v0 }
 0x1a2   : > { %3994 = vmatprep.subr.bf16.mxu0 %v4619_v0  ;;  %3956 = vmatprep.mubr.msk.bf16.mxu1 %vm4620_vm2, %v4619_v0 }
 0x1a3   : > { %3996 = vmatprep.mubr.msk.bf16.mxu0 %vm4620_vm2, %v4619_v0 }
 0x1a4   : > { %3955 = vmatpush3.bf16.msra.mxu1 %v4317_v13 }
 0x1a5   : > { %3995 = vmatpush3.bf16.msra.mxu0 %v4318_v14  ;;  %3968 = vmatprep.subr.bf16.mxu1 %v4619_v0 }
 0x1a6   : > { %4008 = vmatprep.subr.bf16.mxu0 %v4619_v0 }
 0x1a7   : > { %3957 = vmatmul.mubr.msk.bf16.vlgmr.msra.gmra.mrb[16].mxu1 %vm770_vm4, %v1187_v20 }
 0x1a8   : > { %3969 = vmatpush3.bf16.msra.mxu1 %v4321_v18  ;;  %3997 = vmatmul.mubr.msk.bf16.vlgmr.msra.gmra.mrb[24].mxu0 %vm770_vm4, %v1567_v22 }
 0x1a9   : > { %4009 = vmatpush3.bf16.msra.mxu0 %v4324_v21  ;;  %3970 = vmatprep.subr.bf16.mxu1 %v4619_v0 }
 0x1aa   : > { %4010 = vmatprep.subr.bf16.mxu0 %v4619_v0  ;;  %3972 = vmatprep.mubr.msk.bf16.mxu1 %vm4620_vm2, %v4619_v0 }
 0x1ab   : > { %4012 = vmatprep.mubr.msk.bf16.mxu0 %vm4620_vm2, %v4619_v0 }
 0x1ac   : > { %3971 = vmatpush3.bf16.msra.mxu1 %v4325_v23 }
 0x1ad   : > { %4011 = vmatpush3.bf16.msra.mxu0 %v4326_v24  ;;  %3984 = vmatprep.subr.bf16.mxu1 %v4619_v0 }
 0x1ae   : > { %4024 = vmatprep.subr.bf16.mxu0 %v4619_v0 }
 0x1af   : > { %3973 = vmatmul.mubr.msk.bf16.vlgmr.msra.gmra.mrb[20].mxu1 %vm770_vm4, %v1339_v30 }
 0x1b0   : > { %3985 = vmatpush3.bf16.msra.mxu1 %v4329_v28  ;;  %4013 = vmatmul.mubr.msk.bf16.vlgmr.msra.gmra.mrb[28].mxu0 %vm770_vm4, %v1721_v32 }
 0x1b1   : > { %4025 = vmatpush3.bf16.msra.mxu0 %v4332_v31  ;;  %3986 = vmatprep.subr.bf16.mxu1 %v4619_v0 }
 0x1b2   : > { %4026 = vmatprep.subr.bf16.mxu0 %v4619_v0  ;;  %3988 = vmatprep.mubr.msk.bf16.mxu1 %vm4620_vm2, %v4619_v0 }
 0x1b3   : > { %4028 = vmatprep.mubr.msk.bf16.mxu0 %vm4620_vm2, %v4619_v0 }
 0x1b4   : > { %3987 = vmatpush3.bf16.msra.mxu1 %v4333_v33 }
 0x1b5   : > { %4027 = vmatpush3.bf16.msra.mxu0 %v4334_v34  ;;  %4000 = vmatprep.subr.bf16.mxu1 %v4619_v0 }
 0x1b6   : > { %4040 = vmatprep.subr.bf16.mxu0 %v4619_v0 }
 0x1b7   : > { %3989 = vmatmul.mubr.msk.bf16.vlgmr.msra.gmra.mrb[24].mxu1 %vm770_vm4, %v1491_v40 }
 0x1b8   : > { %4001 = vmatpush3.bf16.msra.mxu1 %v4337_v38  ;;  %4029 = vmatmul.mubr.msk.bf16.vlgmr.msra.gmra.mrb[32].mxu0 %vm770_vm4, %v1873_v41 }
 0x1b9   : > { %4002 = vmatprep.subr.bf16.mxu1 %v4619_v0  ;;  %4004 = vmatprep.mubr.msk.bf16.mxu1 %vm4620_vm2, %v4619_v0 }
 0x1ba   : > { %4044 = vmatprep.mubr.msk.bf16.mxu0 %vm4620_vm2, %v4619_v0  ;;  %4041 = vmatpush3.bf16.msra.mxu0 %v4348_v52 }
 0x1bb   : > { %4042 = vmatprep.subr.bf16.mxu0 %v4619_v0 }
 0x1bc   : > { %4003 = vmatpush3.bf16.msra.mxu1 %v4340_v42 }
 0x1bd   : > { %4016 = vmatprep.subr.bf16.mxu1 %v4619_v0 }
 0x1be   : > { %4043 = vmatpush3.bf16.msra.mxu0 %v4350_v54 }
 0x1bf   : > { %4005 = vmatmul.mubr.msk.bf16.vlgmr.msra.gmra.mrb[28].mxu1 %vm770_vm4, %v1644_v46  ;;  %4056 = vmatprep.subr.bf16.mxu0 %v4619_v0 }
 0x1c0   : > { %4017 = vmatpush3.bf16.msra.mxu1 %v4343_v45  ;;  %4020 = vmatprep.mubr.msk.bf16.mxu1 %vm4620_vm2, %v4619_v0 }
 0x1c1   : > { %4018 = vmatprep.subr.bf16.mxu1 %v4619_v0 }
 0x1c4   : > { %4019 = vmatpush3.bf16.msra.mxu1 %v4344_v47 }
 0x1c5   : > { %4032 = vmatprep.subr.bf16.mxu1 %v4619_v0 }
 0x1c7   : > { %4021 = vmatmul.mubr.msk.bf16.vlgmr.msra.gmra.mrb[32].mxu1 %vm770_vm4, %v1797_v50 }
 0x1c8   : > { %4036 = vmatprep.mubr.msk.bf16.mxu1 %vm4620_vm2, %v4619_v0  ;;  %4033 = vmatpush3.bf16.msra.mxu1 %v4347_v51 }
 0x1c9   : > { %4034 = vmatprep.subr.bf16.mxu1 %v4619_v0 }
 0x1cc   : > { %4035 = vmatpush3.bf16.msra.mxu1 %v4349_v53 }
 0x1cd   : > { %4048 = vmatprep.subr.bf16.mxu1 %v4619_v0 }
 0x25a   : > { %v808_v55 = vpop.f32.mrb[0].mxu1 }
 0x25b   : > { %v1014_v56 = vpop.f32.mrb[8].mxu0  ;;  %v3910_v57 = vpop.f32.mrb[1].mxu1 }
 0x25c   : > { %v3934_v58 = vpop.f32.mrb[9].mxu0  ;;  %v811_v59 = vpop.f32.mrb[2].mxu1 }
 0x25d   : > { %v1017_v60 = vpop.f32.mrb[10].mxu0  ;;  %v3911_v61 = vpop.f32.mrb[3].mxu1 }
 0x25e   : > { %v3935_v62 = vpop.f32.mrb[11].mxu0 }
 0x262   : > { %v864_v63 = vpop.f32.mrb[4].mxu1 }
 0x263   : > { %v865_v1 = vadd.f32 %v864_v63, %v808_v55  ;;  %v1166_v2 = vpop.f32.mrb[12].mxu0  ;;  %v3918_v3 = vpop.f32.mrb[5].mxu1 }
 0x264   : > { %v3950_v4 = vpop.f32.mrb[13].mxu0  ;;  %v867_v5 = vpop.f32.mrb[6].mxu1 }
 0x265   : > { %v868_v6 = vadd.f32 %v867_v5, %v811_v59  ;;  %v1169_v7 = vpop.f32.mrb[14].mxu0  ;;  %v3919_v8 = vpop.f32.mrb[7].mxu1 }
 0x266   : > { %v3951_v9 = vpop.f32.mrb[15].mxu0 }
 0x26a   : > { %v938_v10 = vpop.f32.mrb[8].mxu1 }
 0x26b   : > { %v945_v11 = vadd.f32 %v938_v10, %v865_v1  ;;  %v1318_v12 = vpop.f32.mrb[16].mxu0  ;;  %v3926_v13 = vpop.f32.mrb[9].mxu1 }
 0x26c   : > { %v3966_v14 = vpop.f32.mrb[17].mxu0  ;;  %v941_v15 = vpop.f32.mrb[10].mxu1 }
 0x26d   : > { %v946_v16 = vadd.f32 %v941_v15, %v868_v6  ;;  %v1321_v17 = vpop.f32.mrb[18].mxu0  ;;  %v3927_v18 = vpop.f32.mrb[11].mxu1  ;;  %v1021_v19 = vadd.f32 %v1014_v56, %v945_v11 }
 0x26e   : > { %v3967_v20 = vpop.f32.mrb[19].mxu0  ;;  %v3700_v18 = vld [vmem:[%s5292_s4] ss:$0 sm:$0xff] }
 0x26f   : > { %v1022_v21 = vadd.f32 %v1017_v60, %v946_v16 }
 0x272   : > { %v1090_v22 = vpop.f32.mrb[12].mxu1 }
 0x273   : > { %v1097_v23 = vadd.f32 %v1090_v22, %v1021_v19  ;;  %v1470_v24 = vpop.f32.mrb[20].mxu0  ;;  %v3942_v25 = vpop.f32.mrb[13].mxu1 }
 0x274   : > { %v3982_v26 = vpop.f32.mrb[21].mxu0  ;;  %v1093_v27 = vpop.f32.mrb[14].mxu1 }
 0x275   : > { %v1098_v28 = vadd.f32 %v1093_v27, %v1022_v21  ;;  %v1473_v29 = vpop.f32.mrb[22].mxu0  ;;  %v3943_v30 = vpop.f32.mrb[15].mxu1  ;;  %v1173_v31 = vadd.f32 %v1166_v2, %v1097_v23 }
 0x276   : > { %v3983_v32 = vpop.f32.mrb[23].mxu0 }
 0x277   : > { %v1174_v33 = vadd.f32 %v1169_v7, %v1098_v28  ;;  %v4355_v32 = vld [vmem:[#allocation9 + $0x20] sm:$0xff]  }
 0x27a   : > { %v1242_v34 = vpop.f32.mrb[16].mxu1 }
 0x27b   : > { %v1249_v35 = vadd.f32 %v1242_v34, %v1173_v31  ;;  %v1622_v36 = vpop.f32.mrb[24].mxu0  ;;  %v3958_v37 = vpop.f32.mrb[17].mxu1 }
 0x27c   : > { %v3998_v38 = vpop.f32.mrb[25].mxu0  ;;  %v1245_v39 = vpop.f32.mrb[18].mxu1 }
 0x27d   : > { %v1250_v40 = vadd.f32 %v1245_v39, %v1174_v33  ;;  %v1625_v41 = vpop.f32.mrb[26].mxu0  ;;  %v3959_v42 = vpop.f32.mrb[19].mxu1  ;;  %v1325_v43 = vadd.f32 %v1318_v12, %v1249_v35  ;;  %v4357_v38 = vld [vmem:[#allocation9 + $0x28] sm:$0xff]   ;;  %v4358_v39 = vld [vmem:[#allocation9 + $0x38] sm:$0xff]  }
 0x27e   : > { %v3999_v44 = vpop.f32.mrb[27].mxu0  ;;  %v4363_v42 = vld [vmem:[#allocation9 + $0x40] sm:$0xff]  }
 0x27f   : > { %v1326_v45 = vadd.f32 %v1321_v17, %v1250_v40 }
 0x282   : > { %v1394_v46 = vpop.f32.mrb[20].mxu1 }
 0x283   : > { %v1401_v47 = vadd.f32 %v1394_v46, %v1325_v43  ;;  %v1776_v48 = vpop.f32.mrb[28].mxu0  ;;  %v3974_v49 = vpop.f32.mrb[21].mxu1  ;;  %v4364_v46 = vld [vmem:[#allocation9 + $0x50] sm:$0xff]  }
 0x284   : > { %v4014_v50 = vpop.f32.mrb[29].mxu0  ;;  %v1397_v51 = vpop.f32.mrb[22].mxu1  ;;  %v4366_v49 = vld [vmem:[#allocation9 + $0x58] sm:$0xff]  }
 0x285   : > { %v1402_v52 = vadd.f32 %v1397_v51, %v1326_v45  ;;  %v1779_v53 = vpop.f32.mrb[30].mxu0  ;;  %v3975_v54 = vpop.f32.mrb[23].mxu1  ;;  %v1477_v55 = vadd.f32 %v1470_v24, %v1401_v47 }
 0x286   : > { %v4015_v56 = vpop.f32.mrb[31].mxu0  ;;  %v4371_v54 = vld [vmem:[#allocation9 + $0x60] sm:$0xff]  }
 0x287   : > { %v1478_v57 = vadd.f32 %v1473_v29, %v1402_v52  ;;  %v4372_v56 = vld [vmem:[#allocation9 + $0x70] sm:$0xff]  }
 0x28a   : > { %v1546_v58 = vpop.f32.mrb[24].mxu1 }
 0x28b   : > { %v1553_v59 = vadd.f32 %v1546_v58, %v1477_v55  ;;  %v1928_v60 = vpop.f32.mrb[32].mxu0  ;;  %v3990_v61 = vpop.f32.mrb[25].mxu1  ;;  %v4373_v58 = vld [vmem:[#allocation9 + $0x68] sm:$0xff]  }
 0x28c   : > { %v4030_v62 = vpop.f32.mrb[33].mxu0  ;;  %v1549_v63 = vpop.f32.mrb[26].mxu1 }
 0x28d   : > { %v1554_v1 = vadd.f32 %v1549_v63, %v1478_v57  ;;  %v1931_v2 = vpop.f32.mrb[34].mxu0  ;;  %v3991_v3 = vpop.f32.mrb[27].mxu1  ;;  %v1629_v4 = vadd.f32 %v1622_v36, %v1553_v59  ;;  %v4356_v36 = vld [vmem:[#allocation9 + $0x30] sm:$0xff]   ;;  %v4374_v59 = vld [vmem:[#allocation9 + $0x78] sm:$0xff]  }
 0x28e   : > { %v4031_v5 = vpop.f32.mrb[35].mxu0 }
 0x28f   : > { %v1630_v6 = vadd.f32 %v1625_v41, %v1554_v1  ;;  %v4379_v1 = vld [vmem:[#allocation9 + $0x80] sm:$0xff]  }
 0x292   : > { %v1699_v7 = vpop.f32.mrb[28].mxu1 }
 0x293   : > { %v1706_v8 = vadd.f32 %v1699_v7, %v1629_v4  ;;  %v4006_v9 = vpop.f32.mrb[29].mxu1  ;;  %v4380_v4 = vld [vmem:[#allocation9 + $0x88] sm:$0xff]  }
 0x294   : > { %v1702_v10 = vpop.f32.mrb[30].mxu1  ;;  %v4384_v9 = vld [vmem:[%s5295_s7 + $0x8] sm:$0xff]  }
 0x295   : > { %v1707_v11 = vadd.f32 %v1702_v10, %v1630_v6  ;;  %v4007_v12 = vpop.f32.mrb[31].mxu1  ;;  %v1783_v13 = vadd.f32 %v1776_v48, %v1706_v8  ;;  %v4365_v48 = vld [vmem:[#allocation9 + $0x48] sm:$0xff]   ;;  %v4383_v8 = vld [vmem:[%s5295_s7] sm:$0xff]  }
 0x297   : > { %v1784_v14 = vadd.f32 %v1779_v53, %v1707_v11 }
 0x29a   : > { %v1852_v15 = vpop.f32.mrb[32].mxu1 }
 0x29b   : > { %v1859_v16 = vadd.f32 %v1852_v15, %v1783_v13  ;;  %v4022_v17 = vpop.f32.mrb[33].mxu1 }
 0x29c   : > { %v1855_v19 = vpop.f32.mrb[34].mxu1 }
 0x29d   : > { %v1935_v20 = vadd.f32 %v1928_v60, %v1859_v16  ;;  %v1860_v21 = vadd.f32 %v1855_v19, %v1784_v14  ;;  %v4023_v22 = vpop.f32.mrb[35].mxu1 }
 0x29f   : > { %v5095_v23 = vadd.f32 %v3700_v18, %v1935_v20  ;;  %v1936_v24 = vadd.f32 %v1931_v2, %v1860_v21 }
 0x2a1   : > { %v1946_v25 = vmax.f32 %v5095_v23, 0.0  ;;  %v5098_v26 = vadd.f32 %v3700_v18, %v1936_v24 }
 0x2a3   : > { %v1950_v27 = vcombine.high %v1946_v25, %v1946_v25  ;;  %1955 = vst.msk [vmem:[#allocation3 + $0x9] sm:$0xf] %vm684_vm3, %v1946_v25  ;;  %v1947_v28 = vmax.f32 %v5098_v26, 0.0 }
 0x2a5   : > { %1956 = vst.msk [vmem:[#allocation3 + $0x11] sm:$0xf] %vm684_vm3, %v1950_v27  ;;  %v1951_v29 = vcombine.high %v1947_v28, %v1947_v28  ;;  %1957 = vst.msk [vmem:[#allocation3 + $0x19] sm:$0xf] %vm684_vm3, %v1947_v28 }
 0x2a7   : > { %1958 = vst.msk [vmem:[#allocation3 + $0x21] sm:$0xf] %vm684_vm3, %v1951_v29 }
 0x2aa   : > { %v4351_v30 = vld [vmem:[#allocation3 + $0x1] ss:$8 sps:$4 sm:$0xff]  }
 0x2ab   : > { %v4353_v31 = vld [vmem:[#allocation3] ss:$8 sps:$4 sm:$0xff]  }
 0x2ac   : > { %v4352_v33 = vld [vmem:[#allocation3 + $0x11] ss:$8 sps:$4 sm:$0xff]   ;;  %v4359_v43 = vld [vmem:[#allocation3 + $0x2] ss:$8 sps:$4 sm:$0xff]  }
 0x2ad   : > { %v4354_v34 = vld [vmem:[#allocation3 + $0x10] ss:$8 sps:$4 sm:$0xff]   ;;  %v1988_v35 = vpack.c.bf16 %v4352_v33, %v4351_v30 }
 0x2ae   : > { %v1971_v37 = vpack.c.bf16 %v4354_v34, %v4353_v31  ;;  %v4360_v40 = vld [vmem:[#allocation3 + $0x12] ss:$8 sps:$4 sm:$0xff]   ;;  %v4376_v60 = vld [vmem:[#allocation3 + $0x20] ss:$8 sps:$4 sm:$0xff]  }
 0x2af   : > { %4037 = vmatmul.mubr.msk.bf16.vlgmr.msra.gmra.mrb[36].mxu1 %vm770_vm4, %v1988_v35  ;;  %v4362_v41 = vld [vmem:[#allocation3 + $0x18] ss:$8 sps:$4 sm:$0xff]   ;;  %v4361_v44 = vld [vmem:[#allocation3 + $0x8] ss:$8 sps:$4 sm:$0xff]   ;;  %v2118_v45 = vpack.c.bf16 %v4360_v40, %v4359_v43 }
 0x2b0   : > { %4045 = vmatmul.mubr.msk.bf16.vlgmr.msra.gmra.mrb[36].mxu0 %vm770_vm4, %v1971_v37  ;;  %4049 = vmatpush3.bf16.msra.mxu1 %v4355_v32  ;;  %v2194_v47 = vpack.c.bf16 %v4362_v41, %v4361_v44  ;;  %v4368_v50 = vld [vmem:[#allocation3 + $0x19] ss:$8 sps:$4 sm:$0xff]   ;;  %v4367_v52 = vld [vmem:[#allocation3 + $0x9] ss:$8 sps:$4 sm:$0xff]  }
 0x2b1   : > { %4057 = vmatpush3.bf16.msra.mxu0 %v4356_v36  ;;  %4050 = vmatprep.subr.bf16.mxu1 %v4619_v0  ;;  %v4370_v51 = vld [vmem:[#allocation3 + $0x1a] ss:$8 sps:$4 sm:$0xff]   ;;  %v4369_v53 = vld [vmem:[#allocation3 + $0xa] ss:$8 sps:$4 sm:$0xff]   ;;  %v2270_v55 = vpack.c.bf16 %v4368_v50, %v4367_v52 }
 0x2b2   : > { %4058 = vmatprep.subr.bf16.mxu0 %v4619_v0  ;;  %4052 = vmatprep.mubr.msk.bf16.mxu1 %vm4620_vm2, %v4619_v0  ;;  %v2346_v57 = vpack.c.bf16 %v4370_v51, %v4369_v53  ;;  %v4378_v61 = vld [vmem:[#allocation3 + $0x21] ss:$8 sps:$4 sm:$0xff]   ;;  %v4375_v62 = vld [vmem:[#allocation3 + $0x10] ss:$8 sps:$4 sm:$0xff]  }
 0x2b3   : > { %4060 = vmatprep.mubr.msk.bf16.mxu0 %vm4620_vm2, %v4619_v0  ;;  %v4377_v63 = vld [vmem:[#allocation3 + $0x11] ss:$8 sps:$4 sm:$0xff]   ;;  %v2423_v2 = vpack.c.bf16 %v4376_v60, %v4375_v62  ;;  %v4382_v5 = vld [vmem:[#allocation3 + $0x22] ss:$8 sps:$4 sm:$0xff]  }
 0x2b4   : > { %4051 = vmatpush3.bf16.msra.mxu1 %v4357_v38  ;;  %v2499_v3 = vpack.c.bf16 %v4378_v61, %v4377_v63  ;;  %v4381_v6 = vld [vmem:[#allocation3 + $0x12] ss:$8 sps:$4 sm:$0xff]  }
 0x2b5   : > { %4059 = vmatpush3.bf16.msra.mxu0 %v4358_v39  ;;  %4064 = vmatprep.subr.bf16.mxu1 %v4619_v0  ;;  %v2575_v7 = vpack.c.bf16 %v4382_v5, %v4381_v6 }
 0x2b6   : > { %4072 = vmatprep.subr.bf16.mxu0 %v4619_v0 }
 0x2b7   : > { %4053 = vmatmul.mubr.msk.bf16.vlgmr.msra.gmra.mrb[40].mxu1 %vm770_vm4, %v2118_v45 }
 0x2b8   : > { %4061 = vmatmul.mubr.msk.bf16.vlgmr.msra.gmra.mrb[40].mxu0 %vm770_vm4, %v2194_v47  ;;  %4065 = vmatpush3.bf16.msra.mxu1 %v4363_v42 }
 0x2b9   : > { %4073 = vmatpush3.bf16.msra.mxu0 %v4364_v46  ;;  %4066 = vmatprep.subr.bf16.mxu1 %v4619_v0 }
 0x2ba   : > { %4074 = vmatprep.subr.bf16.mxu0 %v4619_v0  ;;  %4068 = vmatprep.mubr.msk.bf16.mxu1 %vm4620_vm2, %v4619_v0 }
 0x2bb   : > { %4076 = vmatprep.mubr.msk.bf16.mxu0 %vm4620_vm2, %v4619_v0 }
 0x2bc   : > { %4067 = vmatpush3.bf16.msra.mxu1 %v4365_v48 }
 0x2bd   : > { %4075 = vmatpush3.bf16.msra.mxu0 %v4366_v49  ;;  %4080 = vmatprep.subr.bf16.mxu1 %v4619_v0 }
 0x2be   : > { %4088 = vmatprep.subr.bf16.mxu0 %v4619_v0 }
 0x2bf   : > { %4069 = vmatmul.mubr.msk.bf16.vlgmr.msra.gmra.mrb[44].mxu1 %vm770_vm4, %v2270_v55 }
 0x2c0   : > { %4077 = vmatmul.mubr.msk.bf16.vlgmr.msra.gmra.mrb[44].mxu0 %vm770_vm4, %v2346_v57  ;;  %4081 = vmatpush3.bf16.msra.mxu1 %v4371_v54 }
 0x2c1   : > { %4089 = vmatpush3.bf16.msra.mxu0 %v4372_v56  ;;  %4082 = vmatprep.subr.bf16.mxu1 %v4619_v0 }
 0x2c2   : > { %4090 = vmatprep.subr.bf16.mxu0 %v4619_v0  ;;  %4084 = vmatprep.mubr.msk.bf16.mxu1 %vm4620_vm2, %v4619_v0 }
 0x2c3   : > { %4092 = vmatprep.mubr.msk.bf16.mxu0 %vm4620_vm2, %v4619_v0 }
 0x2c4   : > { %4083 = vmatpush3.bf16.msra.mxu1 %v4373_v58 }
 0x2c5   : > { %4091 = vmatpush3.bf16.msra.mxu0 %v4374_v59  ;;  %4096 = vmatprep.subr.bf16.mxu1 %v4619_v0  ;;  %v3728_v59 = vld [vmem:[%s5294_s6] ss:$0 sm:$0xff] }
 0x2c6   : > { %4104 = vmatprep.subr.bf16.mxu0 %v4619_v0 }
 0x2c7   : > { %4085 = vmatmul.mubr.msk.bf16.vlgmr.msra.gmra.mrb[48].mxu1 %vm770_vm4, %v2423_v2 }
 0x2c8   : > { %4093 = vmatmul.mubr.msk.bf16.vlgmr.msra.gmra.mrb[48].mxu0 %vm770_vm4, %v2499_v3  ;;  %4097 = vmatpush3.bf16.msra.mxu1 %v4379_v1 }
 0x2c9   : > { %4098 = vmatprep.subr.bf16.mxu1 %v4619_v0  ;;  %4100 = vmatprep.mubr.msk.bf16.mxu1 %vm4620_vm2, %v4619_v0 }
 0x2ca   : > { %4108 = vmatprep.mubr.msk.bf16.mxu0 %vm4620_vm2, %v4619_v0  ;;  %4105 = vmatpush3.bf16.msra.mxu0 %v4383_v8  ;;  %v4386_v8 = vld [vmem:[#allocation10] sm:$0xff]  }
 0x2cb   : > { %4106 = vmatprep.subr.bf16.mxu0 %v4619_v0 }
 0x2cc   : > { %4099 = vmatpush3.bf16.msra.mxu1 %v4380_v4 }
 0x2cd   : > { %4112 = vmatprep.subr.bf16.mxu1 %v4619_v0 }
 0x2ce   : > { %4107 = vmatpush3.bf16.msra.mxu0 %v4384_v9  ;;  %v4387_v9 = vld [vmem:[#allocation10 + $0x18] sm:$0xff]  }
 0x2cf   : > { %4101 = vmatmul.mubr.msk.bf16.vlgmr.msra.gmra.mrb[52].mxu1 %vm770_vm4, %v2575_v7  ;;  %4120 = vmatprep.subr.bf16.mxu0 %v4619_v0  ;;  %v4385_v7 = vld [vmem:[#allocation10 + $0x10] sm:$0xff]  }
 0x2d0   : > { %4116 = vmatprep.mubr.msk.bf16.mxu1 %vm4620_vm2, %v4619_v0  ;;  %4113 = vmatpush3.bf16.msra.mxu1 %v4385_v7 }
 0x2d1   : > { %4114 = vmatprep.subr.bf16.mxu1 %v4619_v0 }
 0x2d4   : > { %4115 = vmatpush3.bf16.msra.mxu1 %v4387_v9 }
 0x2d5   : > { %4128 = vmatprep.subr.bf16.mxu1 %v4619_v0 }
 0x382   : > { %v2043_v10 = vpop.f32.mrb[36].mxu1 }
 0x383   : > { %v2099_v11 = vpop.f32.mrb[36].mxu0  ;;  %v4038_v12 = vpop.f32.mrb[37].mxu1 }
 0x384   : > { %v2100_v13 = vadd.f32 %v2099_v11, %v2043_v10  ;;  %v4046_v14 = vpop.f32.mrb[37].mxu0  ;;  %v2046_v15 = vpop.f32.mrb[38].mxu1  ;;  %v4388_v10 = vld [vmem:[#allocation10 + $0x8] sm:$0xff]   ;;  %v3732_v12 = vld [vmem:[%s5330_s8] ss:$0 sm:$0xff]  ;;  %s3522_s8 = sshll.u32 %s502_s21, 4  ;;  %s5236_s8 = int_to_ptr.vmem [resolvable:$true] %s3522_s8 }
 0x385   : > { %v2102_v16 = vpop.f32.mrb[38].mxu0  ;;  %v4039_v17 = vpop.f32.mrb[39].mxu1  ;;  %s4537_s30 = scalar_lea.vmem %s5236_s8, 256 }
 0x386   : > { %v2103_v18 = vadd.f32 %v2102_v16, %v2046_v15  ;;  %v4047_v19 = vpop.f32.mrb[39].mxu0  ;;  %p4538_p10 = scmp.ne.s32.totalorder %s5236_s8, %s4537_s30 }
 0x388   : > { %p4539_p3 = pnand %p4538_p10, %p4848_p5 }
 0x38a   : > { %v2173_v20 = vpop.f32.mrb[40].mxu1  ;;  %p4540_p7 = pneg %p4539_p3 }
 0x38b   : > { %v2180_v21 = vadd.f32 %v2173_v20, %v2100_v13  ;;  %v2249_v22 = vpop.f32.mrb[40].mxu0  ;;  %v4054_v24 = vpop.f32.mrb[41].mxu1 }
 0x38c   : > { %v4062_v25 = vpop.f32.mrb[41].mxu0  ;;  %v2176_v27 = vpop.f32.mrb[42].mxu1 }
 0x38d   : > { %v2256_v28 = vadd.f32 %v2249_v22, %v2180_v21  ;;  %v2181_v29 = vadd.f32 %v2176_v27, %v2103_v18  ;;  %v2252_v30 = vpop.f32.mrb[42].mxu0  ;;  %v4055_v31 = vpop.f32.mrb[43].mxu1 }
 0x38e   : > { %v4063_v32 = vpop.f32.mrb[43].mxu0 }
 0x38f   : > { %v2257_v33 = vadd.f32 %v2252_v30, %v2181_v29  ;;  %v4394_v30 = vld [vmem:[#allocation10 + $0x30] sm:$0xff]   ;;  %v4395_v32 = vld [vmem:[#allocation10 + $0x28] sm:$0xff]  }
 0x392   : > { %v2325_v34 = vpop.f32.mrb[44].mxu1 }
 0x393   : > { %v2332_v35 = vadd.f32 %v2325_v34, %v2256_v28  ;;  %v2401_v36 = vpop.f32.mrb[44].mxu0  ;;  %v4070_v37 = vpop.f32.mrb[45].mxu1 }
 0x394   : > { %v4078_v38 = vpop.f32.mrb[45].mxu0  ;;  %v2328_v39 = vpop.f32.mrb[46].mxu1 }
 0x395   : > { %v2408_v40 = vadd.f32 %v2401_v36, %v2332_v35  ;;  %v2333_v41 = vadd.f32 %v2328_v39, %v2257_v33  ;;  %v2404_v42 = vpop.f32.mrb[46].mxu0  ;;  %v4071_v43 = vpop.f32.mrb[47].mxu1  ;;  %v4396_v33 = vld [vmem:[#allocation10 + $0x38] sm:$0xff]   ;;  %v4401_v36 = vld [vmem:[#allocation10 + $0x40] sm:$0xff]  }
 0x396   : > { %v4079_v44 = vpop.f32.mrb[47].mxu0  ;;  %v4404_v43 = vld [vmem:[#allocation10 + $0x58] sm:$0xff]  }
 0x397   : > { %v2409_v45 = vadd.f32 %v2404_v42, %v2333_v41  ;;  %v4403_v42 = vld [vmem:[#allocation10 + $0x48] sm:$0xff]  }
 0x39a   : > { %v2478_v46 = vpop.f32.mrb[48].mxu1 }
 0x39b   : > { %v2485_v47 = vadd.f32 %v2478_v46, %v2408_v40  ;;  %v2554_v48 = vpop.f32.mrb[48].mxu0  ;;  %v4086_v49 = vpop.f32.mrb[49].mxu1  ;;  %v4402_v40 = vld [vmem:[#allocation10 + $0x50] sm:$0xff]  }
 0x39c   : > { %v4094_v50 = vpop.f32.mrb[49].mxu0  ;;  %v2481_v51 = vpop.f32.mrb[50].mxu1 }
 0x39d   : > { %v2561_v52 = vadd.f32 %v2554_v48, %v2485_v47  ;;  %v2486_v53 = vadd.f32 %v2481_v51, %v2409_v45  ;;  %v2557_v54 = vpop.f32.mrb[50].mxu0  ;;  %v4087_v55 = vpop.f32.mrb[51].mxu1  ;;  %v4409_v48 = vld [vmem:[#allocation10 + $0x60] sm:$0xff]   ;;  %v4410_v50 = vld [vmem:[#allocation10 + $0x70] sm:$0xff]  }
 0x39e   : > { %v4095_v56 = vpop.f32.mrb[51].mxu0 }
 0x39f   : > { %v2562_v57 = vadd.f32 %v2557_v54, %v2486_v53  ;;  %v4412_v53 = vld [vmem:[#allocation10 + $0x78] sm:$0xff]  }
 0x3a2   : > { %v2630_v58 = vpop.f32.mrb[52].mxu1 }
 0x3a3   : > { %v2637_v60 = vadd.f32 %v2630_v58, %v2561_v52  ;;  %v4102_v61 = vpop.f32.mrb[53].mxu1  ;;  %v4411_v52 = vld [vmem:[#allocation10 + $0x68] sm:$0xff]   ;;  %v4417_v58 = vld [vmem:[#allocation10 + $0x80] sm:$0xff]  }
 0x3a4   : > { %v2633_v62 = vpop.f32.mrb[54].mxu1  ;;  %v4418_v61 = vld [vmem:[#allocation10 + $0x88] sm:$0xff]  }
 0x3a5   : > { %v2646_v63 = vadd.f32 %v3728_v59, %v2637_v60  ;;  %v2638_v1 = vadd.f32 %v2633_v62, %v2562_v57  ;;  %v4103_v2 = vpop.f32.mrb[55].mxu1 }
 0x3a6   : > { %v4421_v2 = vld [vmem:[%s5331_s23] sm:$0xff]  }
 0x3a7   : > { %v2647_v3 = vadd.f32 %v3728_v59, %v2638_v1  ;;  %v2648_v4 = vmax.f32 %v2646_v63, 0.0 }
 0x3a9   : > { %v2649_v5 = vmax.f32 %v2647_v3, 0.0  ;;  %v4422_v3 = vld [vmem:[%s5331_s23 + $0x8] sm:$0xff]  }
 0x3ab   : > { %v2650_v6 = vpack.c.bf16 %v2649_v5, %v2648_v4 }
 0x3ad   : > { %4109 = vmatmul.mubr.msk.bf16.vlgmr.msra.gmra.mrb[52].mxu0 %vm770_vm4, %v2650_v6 }
 0x3ae   : > { %4124 = vmatprep.mubr.msk.bf16.mxu0 %vm4620_vm2, %v4619_v0  ;;  %4121 = vmatpush3.bf16.msra.mxu0 %v4386_v8 }
 0x3af   : > { %4122 = vmatprep.subr.bf16.mxu0 %v4619_v0 }
 0x3b2   : > { %4123 = vmatpush3.bf16.msra.mxu0 %v4388_v10 }
 0x3b3   : > { %4136 = vmatprep.subr.bf16.mxu0 %v4619_v0 }
 0x480   : > { %v2704_v11 = vpop.f32.mrb[52].mxu0 }
 0x481   : > { %v2711_v13 = vadd.f32 %v2704_v11, %v5095_v23  ;;  %v4110_v14 = vpop.f32.mrb[53].mxu0 }
 0x482   : > { %v2707_v15 = vpop.f32.mrb[54].mxu0 }
 0x483   : > { %v5168_v16 = vadd.f32 %v3732_v12, %v2711_v13  ;;  %v2712_v17 = vadd.f32 %v2707_v15, %v5098_v26  ;;  %v4111_v18 = vpop.f32.mrb[55].mxu0  ;;  %v4393_v26 = vld [vmem:[#allocation10 + $0x20] sm:$0xff]  }
 0x485   : > { %v2722_v19 = vmax.f32 %v5168_v16, 0.0  ;;  %v5172_v20 = vadd.f32 %v3732_v12, %v2712_v17 }
 0x487   : > { %v2726_v21 = vcombine.high %v2722_v19, %v2722_v19  ;;  %2730 = vst.msk [vmem:[#allocation3 + $0x9] sm:$0xf] %vm684_vm3, %v2722_v19  ;;  %v2723_v22 = vmax.f32 %v5172_v20, 0.0 }
 0x489   : > { %2731 = vst.msk [vmem:[#allocation3 + $0x11] sm:$0xf] %vm684_vm3, %v2726_v21  ;;  %v2727_v24 = vcombine.high %v2723_v22, %v2723_v22  ;;  %2732 = vst.msk [vmem:[#allocation3 + $0x19] sm:$0xf] %vm684_vm3, %v2723_v22 }
 0x48b   : > { %2733 = vst.msk [vmem:[#allocation3 + $0x21] sm:$0xf] %vm684_vm3, %v2727_v24 }
 0x48e   : > { %v4389_v23 = vld [vmem:[#allocation3 + $0x1] ss:$8 sps:$4 sm:$0xff]  }
 0x48f   : > { %v4391_v25 = vld [vmem:[#allocation3] ss:$8 sps:$4 sm:$0xff]  }
 0x490   : > { %v4390_v27 = vld [vmem:[#allocation3 + $0x11] ss:$8 sps:$4 sm:$0xff]   ;;  %v4397_v37 = vld [vmem:[#allocation3 + $0x2] ss:$8 sps:$4 sm:$0xff]  }
 0x491   : > { %v4392_v28 = vld [vmem:[#allocation3 + $0x10] ss:$8 sps:$4 sm:$0xff]   ;;  %v2763_v29 = vpack.c.bf16 %v4390_v27, %v4389_v23 }
 0x492   : > { %v2746_v31 = vpack.c.bf16 %v4392_v28, %v4391_v25  ;;  %v4398_v34 = vld [vmem:[#allocation3 + $0x12] ss:$8 sps:$4 sm:$0xff]   ;;  %v4414_v54 = vld [vmem:[#allocation3 + $0x20] ss:$8 sps:$4 sm:$0xff]  }
 0x493   : > { %4117 = vmatmul.mubr.msk.bf16.vlgmr.msra.gmra.mrb[56].mxu1 %vm770_vm4, %v2763_v29  ;;  %v4400_v35 = vld [vmem:[#allocation3 + $0x18] ss:$8 sps:$4 sm:$0xff]   ;;  %v4399_v38 = vld [vmem:[#allocation3 + $0x8] ss:$8 sps:$4 sm:$0xff]   ;;  %v2893_v39 = vpack.c.bf16 %v4398_v34, %v4397_v37 }
 0x494   : > { %4125 = vmatmul.mubr.msk.bf16.vlgmr.msra.gmra.mrb[56].mxu0 %vm770_vm4, %v2746_v31  ;;  %4129 = vmatpush3.bf16.msra.mxu1 %v4393_v26  ;;  %v2969_v41 = vpack.c.bf16 %v4400_v35, %v4399_v38  ;;  %v4406_v44 = vld [vmem:[#allocation3 + $0x19] ss:$8 sps:$4 sm:$0xff]   ;;  %v4405_v46 = vld [vmem:[#allocation3 + $0x9] ss:$8 sps:$4 sm:$0xff]  }
 0x495   : > { %4137 = vmatpush3.bf16.msra.mxu0 %v4394_v30  ;;  %4130 = vmatprep.subr.bf16.mxu1 %v4619_v0  ;;  %v4408_v45 = vld [vmem:[#allocation3 + $0x1a] ss:$8 sps:$4 sm:$0xff]   ;;  %v4407_v47 = vld [vmem:[#allocation3 + $0xa] ss:$8 sps:$4 sm:$0xff]   ;;  %v3045_v49 = vpack.c.bf16 %v4406_v44, %v4405_v46 }
 0x496   : > { %4138 = vmatprep.subr.bf16.mxu0 %v4619_v0  ;;  %4132 = vmatprep.mubr.msk.bf16.mxu1 %vm4620_vm2, %v4619_v0  ;;  %v3121_v51 = vpack.c.bf16 %v4408_v45, %v4407_v47  ;;  %v4416_v55 = vld [vmem:[#allocation3 + $0x21] ss:$8 sps:$4 sm:$0xff]   ;;  %v4413_v56 = vld [vmem:[#allocation3 + $0x10] ss:$8 sps:$4 sm:$0xff]  }
 0x497   : > { %4140 = vmatprep.mubr.msk.bf16.mxu0 %vm4620_vm2, %v4619_v0  ;;  %v4415_v57 = vld [vmem:[#allocation3 + $0x11] ss:$8 sps:$4 sm:$0xff]   ;;  %v3197_v59 = vpack.c.bf16 %v4414_v54, %v4413_v56  ;;  %v4420_v62 = vld [vmem:[#allocation3 + $0x22] ss:$8 sps:$4 sm:$0xff]  }
 0x498   : > { %4131 = vmatpush3.bf16.msra.mxu1 %v4395_v32  ;;  %v3273_v60 = vpack.c.bf16 %v4416_v55, %v4415_v57  ;;  %v4419_v63 = vld [vmem:[#allocation3 + $0x12] ss:$8 sps:$4 sm:$0xff]  }
 0x499   : > { %4139 = vmatpush3.bf16.msra.mxu0 %v4396_v33  ;;  %4144 = vmatprep.subr.bf16.mxu1 %v4619_v0  ;;  %v3349_v1 = vpack.c.bf16 %v4420_v62, %v4419_v63 }
 0x49a   : > { %4152 = vmatprep.subr.bf16.mxu0 %v4619_v0 }
 0x49b   : > { %4133 = vmatmul.mubr.msk.bf16.vlgmr.msra.gmra.mrb[60].mxu1 %vm770_vm4, %v2893_v39 }
 0x49c   : > { %4141 = vmatmul.mubr.msk.bf16.vlgmr.msra.gmra.mrb[60].mxu0 %vm770_vm4, %v2969_v41  ;;  %4145 = vmatpush3.bf16.msra.mxu1 %v4401_v36 }
 0x49d   : > { %4153 = vmatpush3.bf16.msra.mxu0 %v4402_v40  ;;  %4146 = vmatprep.subr.bf16.mxu1 %v4619_v0 }
 0x49e   : > { %4154 = vmatprep.subr.bf16.mxu0 %v4619_v0  ;;  %4148 = vmatprep.mubr.msk.bf16.mxu1 %vm4620_vm2, %v4619_v0 }
 0x49f   : > { %4156 = vmatprep.mubr.msk.bf16.mxu0 %vm4620_vm2, %v4619_v0 }
 0x4a0   : > { %4147 = vmatpush3.bf16.msra.mxu1 %v4403_v42 }
 0x4a1   : > { %4155 = vmatpush3.bf16.msra.mxu0 %v4404_v43  ;;  %4160 = vmatprep.subr.bf16.mxu1 %v4619_v0 }
 0x4a2   : > { %4168 = vmatprep.subr.bf16.mxu0 %v4619_v0 }
 0x4a3   : > { %4149 = vmatmul.mubr.msk.bf16.vlgmr.msra.gmra.mrb[64].mxu1 %vm770_vm4, %v3045_v49 }
 0x4a4   : > { %4157 = vmatmul.mubr.msk.bf16.vlgmr.msra.gmra.mrb[64].mxu0 %vm770_vm4, %v3121_v51  ;;  %4161 = vmatpush3.bf16.msra.mxu1 %v4409_v48 }
 0x4a5   : > { %4169 = vmatpush3.bf16.msra.mxu0 %v4410_v50  ;;  %4162 = vmatprep.subr.bf16.mxu1 %v4619_v0 }
 0x4a6   : > { %4170 = vmatprep.subr.bf16.mxu0 %v4619_v0  ;;  %4164 = vmatprep.mubr.msk.bf16.mxu1 %vm4620_vm2, %v4619_v0 }
 0x4a7   : > { %4172 = vmatprep.mubr.msk.bf16.mxu0 %vm4620_vm2, %v4619_v0 }
 0x4a8   : > { %4163 = vmatpush3.bf16.msra.mxu1 %v4411_v52  ;;  %v3760_v52 = vld [vmem:[%s5332_s14] ss:$0 sm:$0xff]  ;;  %s4621_s14 = smov [#allocation12]  }
 0x4a9   : > { %4171 = vmatpush3.bf16.msra.mxu0 %v4412_v53  ;;  %4176 = vmatprep.subr.bf16.mxu1 %v4619_v0  ;;  %s4541_s16 = sshll.u32 %s4621_s14, 4  ;;  %s4542_s16 = int_to_ptr.vmem [resolvable:$false] %s4541_s16 }
 0x4aa   : > { %4184 = vmatprep.subr.bf16.mxu0 %v4619_v0  ;;  %s4543_s15 = scalar_lea.vmem %s4542_s16, 512  ;;  %p4544_p12 = scmp.lt.s32.totalorder %s5236_s8, %s4542_s16 }
 0x4ab   : > { %4165 = vmatmul.mubr.msk.bf16.vlgmr.msra.gmra.mrb[68].mxu1 %vm770_vm4, %v3197_v59  ;;  %p4545_p1 = scmp.lt.s32.totalorder %s4543_s15, %s4537_s30 }
 0x4ac   : > { %4173 = vmatmul.mubr.msk.bf16.vlgmr.msra.gmra.mrb[68].mxu0 %vm770_vm4, %v3273_v60  ;;  %4177 = vmatpush3.bf16.msra.mxu1 %v4417_v58 }
 0x4ad   : > { %4178 = vmatprep.subr.bf16.mxu1 %v4619_v0  ;;  %4180 = vmatprep.mubr.msk.bf16.mxu1 %vm4620_vm2, %v4619_v0  ;;  %p4546_p2 = por %p4545_p1, %p4544_p12 }
 0x4ae   : > { %4188 = vmatprep.mubr.msk.bf16.mxu0 %vm4620_vm2, %v4619_v0  ;;  %4185 = vmatpush3.bf16.msra.mxu0 %v4421_v2 }
 0x4af   : > { %4186 = vmatprep.subr.bf16.mxu0 %v4619_v0  ;;  %p4547_p4 = pnand %p4546_p2, %p4540_p7 }
 0x4b0   : > { %4179 = vmatpush3.bf16.msra.mxu1 %v4418_v61 }
 0x4b2   : > { %4187 = vmatpush3.bf16.msra.mxu0 %v4422_v3 }
 0x4b3   : > { %4181 = vmatmul.mubr.msk.bf16.vlgmr.msra.gmra.mrb[72].mxu1 %vm770_vm4, %v3349_v1  ;;  %v3764_v1 = vld [vmem:[%s5333_s25] ss:$0 sm:$0xff] }
 0x566   : > { %v2818_v4 = vpop.f32.mrb[56].mxu1 }
 0x567   : > { %v2874_v5 = vpop.f32.mrb[56].mxu0  ;;  %v4118_v6 = vpop.f32.mrb[57].mxu1 }
 0x568   : > { %v2875_v7 = vadd.f32 %v2874_v5, %v2818_v4  ;;  %v4126_v8 = vpop.f32.mrb[57].mxu0  ;;  %v2821_v9 = vpop.f32.mrb[58].mxu1 }
 0x569   : > { %v2877_v10 = vpop.f32.mrb[58].mxu0  ;;  %v4119_v11 = vpop.f32.mrb[59].mxu1 }
 0x56a   : > { %v2878_v12 = vadd.f32 %v2877_v10, %v2821_v9  ;;  %v4127_v13 = vpop.f32.mrb[59].mxu0 }
 0x56e   : > { %v2948_v14 = vpop.f32.mrb[60].mxu1 }
 0x56f   : > { %v2955_v15 = vadd.f32 %v2948_v14, %v2875_v7  ;;  %v3024_v17 = vpop.f32.mrb[60].mxu0  ;;  %v4134_v18 = vpop.f32.mrb[61].mxu1 }
 0x570   : > { %v4142_v19 = vpop.f32.mrb[61].mxu0  ;;  %v2951_v21 = vpop.f32.mrb[62].mxu1 }
 0x571   : > { %v3031_v22 = vadd.f32 %v3024_v17, %v2955_v15  ;;  %v2956_v24 = vadd.f32 %v2951_v21, %v2878_v12  ;;  %v3027_v0 = vpop.f32.mrb[62].mxu0  ;;  %v4135_v23 = vpop.f32.mrb[63].mxu1 }
 0x572   : > { %v4143_v25 = vpop.f32.mrb[63].mxu0 }
 0x573   : > { %v3032_v26 = vadd.f32 %v3027_v0, %v2956_v24 }
 0x576   : > { %v3100_v27 = vpop.f32.mrb[64].mxu1 }
 0x577   : > { %v3107_v28 = vadd.f32 %v3100_v27, %v3031_v22  ;;  %v3176_v29 = vpop.f32.mrb[64].mxu0  ;;  %v4150_v30 = vpop.f32.mrb[65].mxu1 }
 0x578   : > { %v4158_v31 = vpop.f32.mrb[65].mxu0  ;;  %v3103_v32 = vpop.f32.mrb[66].mxu1 }
 0x579   : > { %v3183_v33 = vadd.f32 %v3176_v29, %v3107_v28  ;;  %v3108_v34 = vadd.f32 %v3103_v32, %v3032_v26  ;;  %v3179_v35 = vpop.f32.mrb[66].mxu0  ;;  %v4151_v36 = vpop.f32.mrb[67].mxu1 }
 0x57a   : > { %v4159_v37 = vpop.f32.mrb[67].mxu0 }
 0x57b   : > { %v3184_v38 = vadd.f32 %v3179_v35, %v3108_v34 }
 0x57e   : > { %v3252_v39 = vpop.f32.mrb[68].mxu1 }
 0x57f   : > { %v3259_v40 = vadd.f32 %v3252_v39, %v3183_v33  ;;  %v3328_v41 = vpop.f32.mrb[68].mxu0  ;;  %v4166_v42 = vpop.f32.mrb[69].mxu1 }
 0x580   : > { %v4174_v43 = vpop.f32.mrb[69].mxu0  ;;  %v3255_v44 = vpop.f32.mrb[70].mxu1 }
 0x581   : > { %v3335_v45 = vadd.f32 %v3328_v41, %v3259_v40  ;;  %v3260_v46 = vadd.f32 %v3255_v44, %v3184_v38  ;;  %v3331_v47 = vpop.f32.mrb[70].mxu0  ;;  %v4167_v48 = vpop.f32.mrb[71].mxu1 }
 0x582   : > { %v4175_v49 = vpop.f32.mrb[71].mxu0 }
 0x583   : > { %v3336_v50 = vadd.f32 %v3331_v47, %v3260_v46 }
 0x586   : > { %v3404_v51 = vpop.f32.mrb[72].mxu1 }
 0x587   : > { %v3411_v53 = vadd.f32 %v3404_v51, %v3335_v45  ;;  %v4182_v54 = vpop.f32.mrb[73].mxu1 }
 0x588   : > { %v3407_v55 = vpop.f32.mrb[74].mxu1 }
 0x589   : > { %v3420_v56 = vadd.f32 %v3760_v52, %v3411_v53  ;;  %v3412_v57 = vadd.f32 %v3407_v55, %v3336_v50  ;;  %v4183_v58 = vpop.f32.mrb[75].mxu1 }
 0x58b   : > { %v3421_v59 = vadd.f32 %v3760_v52, %v3412_v57  ;;  %v3422_v60 = vmax.f32 %v3420_v56, 0.0 }
 0x58d   : > { %v3423_v61 = vmax.f32 %v3421_v59, 0.0 }
 0x58f   : > { %v3424_v62 = vpack.c.bf16 %v3423_v61, %v3422_v60 }
 0x591   : > { %4189 = vmatmul.mubr.msk.bf16.vlgmr.msra.gmra.mrb[72].mxu0 %vm770_vm4, %v3424_v62 }
 0x664   : > { %v3478_v63 = vpop.f32.mrb[72].mxu0 }
 0x665   : > { %v3485_v2 = vadd.f32 %v3478_v63, %v5168_v16  ;;  %v4190_v3 = vpop.f32.mrb[73].mxu0 }
 0x666   : > { %v3481_v4 = vpop.f32.mrb[74].mxu0 }
 0x667   : > { %v3494_v5 = vadd.f32 %v3764_v1, %v3485_v2  ;;  %v3486_v6 = vadd.f32 %v3481_v4, %v5172_v20  ;;  %v4191_v7 = vpop.f32.mrb[75].mxu0 }
 0x669   : > { %v3496_v8 = vmax.f32 %v3494_v5, 0.0  ;;  %v3495_v9 = vadd.f32 %v3764_v1, %v3486_v6 }
 0x66b   : > { %v3500_v10 = vcombine.high %v3496_v8, %v3496_v8  ;;  %3504 = vst.msk [vmem:[%s502_s21] sm:$0xf] %vm684_vm3, %v3496_v8  ;;  %v3497_v16 = vmax.f32 %v3495_v9, 0.0 }
 0x66d   : > { %3505 = vst.msk [vmem:[%s502_s21 + $0x4] sm:$0xf] %vm684_vm3, %v3500_v10  ;;  %v3501_v20 = vcombine.high %v3497_v16, %v3497_v16  ;;  %3506 = vst.msk [vmem:[%s502_s21 + $0x8] sm:$0xf] %vm684_vm3, %v3497_v16 }
 0x66f   : > { %3507 = vst.msk [vmem:[%s502_s21 + $0xc] sm:$0xf] %vm684_vm3, %v3501_v20 }
 0x670   : > { %4550 = shalt.err (!%p4547_p4)
}
 0x671   : > { %s4551_s24 = scalar_lea.hbm %s5241_s18, 256  ;;  %s4555_s19 = scalar_lea.hbm %s5334_s20, 512 }
 0x672   : > { %p4552_p9 = scmp.ne.s32.totalorder %s5241_s18, %s4551_s24  ;;  %p4556_p8 = scmp.lt.u32.totalorder %s5241_s18, %s5334_s20 }
 0x673   : > { %p4557_p13 = scmp.lt.u32.totalorder %s4555_s19, %s4551_s24  ;;  %p4559_p10 = scmp.lt.u32.totalorder %s4551_s24, %s5241_s18 }
 0x674   : > { %p4553_p0 = pnand %p4552_p9, %p4848_p5 }
 0x675   : > { %p4558_p6 = por %p4557_p13, %p4556_p8 }
 0x676   : > { %p4554_p11 = pneg %p4553_p0 }
 0x677   : > { %p4560_p3 = por %p4559_p10, %p4558_p6 }
 0x679   : > { %p4561_p7 = pnand %p4560_p3, %p4554_p11 }
 0x67b   : > { %4564 = shalt.err (!%p4561_p7)
}
 0x67c   : > { %s4622_s30 = smov 64   ;;  %s4623_s14 = smov 4  }
 0x67d   : > { %4206 = dma.vmem_to_hbm [thread:$0]  (%p4848_p5), %s5236_s8, 256, %s5241_s18, %s3509_s29, %s4622_s30, %s4622_s30, %s4623_s14  }
 0x67e PF: > { %s5335_s16 = sld [smem:[#allocation17_spill]]  ;;  %s5336_s15 = sld [smem:[#allocation18_spill]] }
 0x67f   : > { %p5338_p1 = scmp.ge.s32.totalorder %s4611_s28, 2 }
 0x684   : > { %s3537_s25 = sand.u32 1, %s5335_s16   ;;  %p5337_p12 = scmp.ne.s32.totalorder %s5336_s15, 0 }
 0x685   : > { %s3538_s24 = scalar_lea.sflag [#allocation6], %s3537_s25 }
 0x686   : > { %p4223_p2 = pnand %p5338_p1, %p5337_p12 }
 0x688   : > { %4594 = dma.done.wait (!%p4223_p2), %s3538_s24, 256  }
 0x689   : > { %4596 = vsyncadd (!%p4223_p2), %s3538_s24, 4294967040  ;;  %p28_p4 = scmp.ge.s32.totalorder %s4834_s13, 4   ;;  %s5339_s25 = smov %s4603_s26 }
 0x68a   : > { %s5340_s26 = smov %s4607_s27  ;;  %s5341_s27 = smov %s4844_s11 }
 0x68b   : > { %s5342_s28 = smov %s4834_s13  ;;  %30 = sbr.rel (!%p28_p4) target bundleno = 13 (0xd), region = 169 }
 0x692   :  { %3543 = vsyncpa [#allocation5], 1 }
 0x693   :  { %3545 = vsyncpa [#allocation5 + $0x1], 1 }
 0x694   :  { %3546 = vsyncpa [#allocation8], 1 }
 0x695   :  { %3547 = vsyncpa [#allocation11], 1 }
 0x696   :  { %3548 = vsyncpa [#allocation6], 1 }
 0x697   :  { %3550 = vsyncpa [#allocation6 + $0x1], 1 }

</bundles_post_ra>
